<compile_context>
chip_gen: v6e
topology: v6e:2x2x1
jax: 0.10.0
libtpu: 0.0.40
codegen_flags: <defaults>
</compile_context>

<pallas_src>
import jax
import jax.numpy as jnp
from jax import lax
from jax.experimental import pallas as pl
from jax.experimental.pallas import tpu as pltpu


def self_attention_kernel(gamma_ref,                      # scalar prefetch (SMEM)
                          q_ref, k_ref, v_ref, x_ref,     # inputs
                          out_ref, attn_ref):             # outputs
    """One (batch b, column-tile jt) grid step.

    q_ref   : (Cq, N)  bf16, channels-first (resident per batch)
    k_ref   : (Cq, TJ) bf16, channels-first column tile
    v_ref   : (C, N)   bf16, channels-first (resident per batch)
    x_ref   : (C, TJ)  f32 residual tile
    out_ref : (C, TJ)  f32 output tile
    attn_ref: (TJ, N)  attention_map rows j0..j0+TJ (stored directly)
    """
    # S^T[j, i] = sum_c K[c, j] * Q[c, i]  -- contract dim 0 with dim 0,
    # no transposes (the MXU consumes the trans_a operand directly).
    s_t = lax.dot_general(k_ref[...], q_ref[...],
                          dimension_numbers=(((0,), (0,)), ((), ())),
                          preferred_element_type=jnp.float32)        # (TJ, N)

    # softmax over i (== torch softmax(dim=-2) of S); these rows are exactly
    # the rows of the returned attention_map.
    s_max = jnp.max(s_t, axis=-1, keepdims=True)
    e = jnp.exp(s_t - s_max)
    attn_f32 = e * pl.reciprocal(jnp.sum(e, axis=-1, keepdims=True), approx=True)

    # Single bf16 cast, reused for the writeback (when attn dtype is bf16)
    # and for the o matmul operand.
    attn_bf16 = attn_f32.astype(jnp.bfloat16)
    if attn_ref.dtype == jnp.bfloat16:
        attn_ref[...] = attn_bf16
    else:
        attn_ref[...] = attn_f32.astype(attn_ref.dtype)

    # o[c, j] = sum_i V[c, i] * attn[j, i]  -- contract dim 1 with dim 1,
    # result lands as (C, TJ) so no final transpose is needed.
    o = lax.dot_general(v_ref[...], attn_bf16,
                        dimension_numbers=(((1,), (1,)), ((), ())),
                        preferred_element_type=jnp.float32)          # (C, TJ)

    out_ref[...] = (x_ref[...] + gamma_ref[0] * o).astype(out_ref.dtype)


def _vmem_bytes_estimate(C, Cq, N, tj, attn_bytes):
    """Rough VMEM footprint (double-buffered blocks + f32 temporaries)."""
    db = 2
    inputs = db * (Cq * N * 2 + Cq * tj * 2 + C * N * 2 + C * tj * 4)
    outputs = db * (C * tj * 4 + tj * N * attn_bytes)
    temps = tj * N * (4 + 4 + 4 + 2) + C * tj * 4   # s_t, e, attn_f32, attn_bf16, o
    return inputs + outputs + temps


def _physical_vmem_bytes():
    try:
        info = pltpu.get_tpu_info()
        for attr in ("vmem_capacity_bytes", "vmem_size_bytes"):
            v = getattr(info, attr, None)
            if v:
                return int(v)
    except Exception:
        pass
    return 64 * 1024 * 1024   # conservative: v7x per-TensorCore VMEM


def self_attention(x_nchw, wq, bq, wk, bk, wv, bv, gamma,
                   *, tj=None, attn_dtype=jnp.bfloat16):
    """SAGAN self-attention forward.

    x_nchw : (B, C, H, W) f32
    wq, wk : (C//8, C) 1x1-conv weights (out_ch, in_ch);  wv: (C, C)
    bq, bk : (C//8,) biases;  bv: (C,);  gamma: scalar
    Returns (out (B,C,H,W) f32, attention_map (B, N, N) attn_dtype), N = H*W.
    """
    B, C, H, W = x_nchw.shape
    N = H * W
    Cq = wq.shape[0]
    attn_bytes = jnp.dtype(attn_dtype).itemsize

    # channels-first flat-spatial: a pure reshape of NCHW, no transposes.
    x_cf = x_nchw.reshape(B, C, N).astype(jnp.float32)

    # 1x1-conv QKV projection hoisted to XLA (f32 compute, tiny vs. the N^2
    # attention); bf16 operands into the kernel's MXU matmuls.
    q = (jnp.einsum('oc,bcn->bon', wq.astype(jnp.float32), x_cf)
         + bq.astype(jnp.float32)[None, :, None]).astype(jnp.bfloat16)   # (B, Cq, N)
    k = (jnp.einsum('oc,bcn->bon', wk.astype(jnp.float32), x_cf)
         + bk.astype(jnp.float32)[None, :, None]).astype(jnp.bfloat16)   # (B, Cq, N)
    v = (jnp.einsum('oc,bcn->bon', wv.astype(jnp.float32), x_cf)
         + bv.astype(jnp.float32)[None, :, None]).astype(jnp.bfloat16)   # (B, C,  N)

    gamma_s = jnp.asarray(gamma, jnp.float32).reshape(1)

    # Column-tile selection against the chip's physical VMEM (64 MiB on v7x,
    # 128 MiB on v5e/v6e); prefer 256-aligned tiles for the 256x256 MXU.
    phys_vmem = _physical_vmem_bytes()
    cap = phys_vmem * 3 // 4
    if tj is None:
        candidates = [t for t in (512, 256, 128) if N % t == 0]
        if candidates:
            tj = candidates[-1]
            for t in candidates:
                if _vmem_bytes_estimate(C, Cq, N, t, attn_bytes) <= cap:
                    tj = t
                    break
        else:
            tj = N   # odd N (e.g. 8x8=64): full-extent blocks, VMEM-checked below
    assert N % tj == 0, "H*W must be divisible by the column-tile size"
    need = _vmem_bytes_estimate(C, Cq, N, tj, attn_bytes)
    assert need <= cap, (
        f"self-attention tile (tj={tj}) needs ~{need>>20} MiB VMEM, "
        f"exceeds ~{cap>>20} MiB budget; pass a smaller tj")
    vmem_limit = int(max(32 * 1024 * 1024, min(need * 3 // 2 + (4 << 20), cap)))
    nj = N // tj

    out_cf, attn = pl.pallas_call(
        self_attention_kernel,
        out_shape=(jax.ShapeDtypeStruct((B, C, N), jnp.float32),
                   jax.ShapeDtypeStruct((B, N, N), attn_dtype)),
        grid_spec=pltpu.PrefetchScalarGridSpec(
            num_scalar_prefetch=1,                                        # gamma -> SMEM
            grid=(B, nj),
            in_specs=[
                pl.BlockSpec((None, Cq, N), lambda b, j, g: (b, 0, 0)),   # Q (per-batch resident)
                pl.BlockSpec((None, Cq, tj), lambda b, j, g: (b, 0, j)),  # K column tile
                pl.BlockSpec((None, C, N),  lambda b, j, g: (b, 0, 0)),   # V (per-batch resident)
                pl.BlockSpec((None, C, tj), lambda b, j, g: (b, 0, j)),   # x residual tile
            ],
            out_specs=[
                pl.BlockSpec((None, C, tj), lambda b, j, g: (b, 0, j)),   # out tile
                pl.BlockSpec((None, tj, N), lambda b, j, g: (b, j, 0)),   # attention rows
            ],
        ),
        compiler_params=pltpu.CompilerParams(
            dimension_semantics=("parallel", "parallel"),
            vmem_limit_bytes=vmem_limit),
    )(gamma_s, q, k, v, x_cf)

    return out_cf.reshape(B, C, H, W), attn


def _reference(x_nchw, wq, bq, wk, bk, wv, bv, gamma):
    """Pure-JAX (f32) reference mirroring the PyTorch forward exactly."""
    B, C, H, W = x_nchw.shape
    N = H * W
    x = x_nchw.reshape(B, C, N)
    q = jnp.einsum('oc,bcn->bon', wq, x) + bq[None, :, None]   # (B, Cq, N)
    k = jnp.einsum('oc,bcn->bon', wk, x) + bk[None, :, None]   # (B, Cq, N)
    v = jnp.einsum('oc,bcn->bon', wv, x) + bv[None, :, None]   # (B, C,  N)
    s = jnp.einsum('bci,bcj->bij', q, k)                       # S[b,i,j]=q_i.k_j
    a_T = jax.nn.softmax(s, axis=-2)                           # softmax over i
    attn = jnp.transpose(a_T, (0, 2, 1))                       # attention_map
    o = jnp.einsum('bci,bij->bcj', v, a_T)                     # (B, C, N)
    out = x + gamma * o
    return out.reshape(B, C, H, W), attn


if __name__ == "__main__":
    B, C, H, W = 2, 16, 16, 16          # in_dim=16 -> query/key channels = 2
    Cq = C // 8
    N = H * W

    key = jax.random.PRNGKey(0)
    kx, kq, kk, kv, kbq, kbk, kbv = jax.random.split(key, 7)

    x = jax.random.normal(kx, (B, C, H, W), dtype=jnp.float32)
    # conv weights in PyTorch (out_ch, in_ch) layout.
    wq = 0.1 * jax.random.normal(kq, (Cq, C), dtype=jnp.float32)
    wk = 0.1 * jax.random.normal(kk, (Cq, C), dtype=jnp.float32)
    wv = 0.1 * jax.random.normal(kv, (C, C), dtype=jnp.float32)
    bq = 0.01 * jax.random.normal(kbq, (Cq,), dtype=jnp.float32)
    bk = 0.01 * jax.random.normal(kbk, (Cq,), dtype=jnp.float32)
    bv = 0.01 * jax.random.normal(kbv, (C,), dtype=jnp.float32)
    gamma = jnp.asarray(0.7, jnp.float32)   # nonzero so the attention path is exercised

    out, attn = self_attention(x, wq, bq, wk, bk, wv, bv, gamma)
    out = jax.block_until_ready(out)
    attn = jax.block_until_ready(attn)

    out_ref, attn_ref = _reference(x, wq, bq, wk, bk, wv, bv, gamma)
    assert out.shape == (B, C, H, W) and attn.shape == (B, N, N)
    # bf16 MXU operands / bf16 attention map (f32 accumulation) -> looser tolerances.
    assert jnp.allclose(out, out_ref, atol=2e-2, rtol=2e-2), \
        float(jnp.max(jnp.abs(out - out_ref)))
    assert jnp.allclose(attn.astype(jnp.float32), attn_ref, atol=1e-2), \
        float(jnp.max(jnp.abs(attn.astype(jnp.float32) - attn_ref)))

    print("KERNEL_OK")
</pallas_src>

<mosaic_0001>
module attributes {stable_mosaic.version = 11 : i64} {
  func.func @self_attention_kernel(%arg0: i32, %arg1: i32, %arg2: memref<1xf32, #tpu.memory_space<smem>>, %arg3: memref<1x2x256xbf16, #tpu.memory_space<vmem>>, %arg4: memref<1x2x256xbf16, #tpu.memory_space<vmem>>, %arg5: memref<1x16x256xbf16, #tpu.memory_space<vmem>>, %arg6: memref<1x16x256xf32, #tpu.memory_space<vmem>>, %arg7: memref<1x16x256xf32, #tpu.memory_space<vmem>>, %arg8: memref<1x256x256xbf16, #tpu.memory_space<vmem>>) attributes {dimension_semantics = [#tpu.dimension_semantics<parallel>, #tpu.dimension_semantics<parallel>], iteration_bounds = array<i64: 2, 1>, scalar_prefetch = 1 : i64, scratch_operands = 0 : i64, tpu.core_type = #tpu.core_type<tc>, window_params = [{transform_indices = @transform_0, window_bounds = array<i64: 1, 2, 256>}, {transform_indices = @transform_1, window_bounds = array<i64: 1, 2, 256>}, {transform_indices = @transform_2, window_bounds = array<i64: 1, 16, 256>}, {transform_indices = @transform_3, window_bounds = array<i64: 1, 16, 256>}, {transform_indices = @transform_4, window_bounds = array<i64: 1, 16, 256>}, {transform_indices = @transform_5, window_bounds = array<i64: 1, 256, 256>}]} {
    %c0 = arith.constant 0 : index
    %c0_0 = arith.constant 0 : index
    %c0_1 = arith.constant 0 : index
    %0 = vector.load %arg4[%c0, %c0_0, %c0_1] : memref<1x2x256xbf16, #tpu.memory_space<vmem>>, vector<1x2x256xbf16>
    %1 = vector.shape_cast %0 : vector<1x2x256xbf16> to vector<2x256xbf16>
    %c0_2 = arith.constant 0 : index
    %c0_3 = arith.constant 0 : index
    %c0_4 = arith.constant 0 : index
    %2 = vector.load %arg3[%c0_2, %c0_3, %c0_4] : memref<1x2x256xbf16, #tpu.memory_space<vmem>>, vector<1x2x256xbf16>
    %3 = vector.shape_cast %2 : vector<1x2x256xbf16> to vector<2x256xbf16>
    %cst = arith.constant dense<0.000000e+00> : vector<256x256xf32>
    %4 = tpu.matmul %1, %3, %cst {dimension_numbers = #tpu.dot_dimension_numbers<[0], [0], [1], [1], [0, 1, 1, 1], [], []>} : vector<2x256xbf16>, vector<2x256xbf16>, vector<256x256xf32> -> vector<256x256xf32>
    %cst_5 = arith.constant dense<0xFF800000> : vector<256xf32>
    %5 = vector.multi_reduction <maximumf>, %4, %cst_5 [1] : vector<256x256xf32> to vector<256xf32>
    %6 = vector.shape_cast %5 : vector<256xf32> to vector<256x1xf32>
    %7 = vector.broadcast %6 : vector<256x1xf32> to vector<256x256xf32>
    %8 = arith.subf %4, %7 : vector<256x256xf32>
    %9 = math.exp %8 : vector<256x256xf32>
    %cst_6 = arith.constant dense<0.000000e+00> : vector<256xf32>
    %10 = vector.multi_reduction <add>, %9, %cst_6 [1] : vector<256x256xf32> to vector<256xf32>
    %11 = vector.shape_cast %10 : vector<256xf32> to vector<256x1xf32>
    %12 = tpu.reciprocal %11 {approx = true} : vector<256x1xf32> -> vector<256x1xf32>
    %13 = vector.broadcast %12 : vector<256x1xf32> to vector<256x256xf32>
    %14 = arith.mulf %9, %13 : vector<256x256xf32>
    %15 = arith.truncf %14 : vector<256x256xf32> to vector<256x256xbf16>
    %c0_7 = arith.constant 0 : index
    %c0_8 = arith.constant 0 : index
    %c0_9 = arith.constant 0 : index
    %16 = vector.load %arg8[%c0_7, %c0_8, %c0_9] : memref<1x256x256xbf16, #tpu.memory_space<vmem>>, vector<1x256x256xbf16>
    %17 = vector.shape_cast %16 : vector<1x256x256xbf16> to vector<256x256xbf16>
    %18 = vector.shape_cast %15 : vector<256x256xbf16> to vector<1x256x256xbf16>
    tpu.vector_store %arg8[%c0_7, %c0_8, %c0_9], %18 {strides = array<i32>} : memref<1x256x256xbf16, #tpu.memory_space<vmem>>, vector<1x256x256xbf16>,
    %c0_10 = arith.constant 0 : index
    %c0_11 = arith.constant 0 : index
    %c0_12 = arith.constant 0 : index
    %19 = vector.load %arg5[%c0_10, %c0_11, %c0_12] : memref<1x16x256xbf16, #tpu.memory_space<vmem>>, vector<1x16x256xbf16>
    %20 = vector.shape_cast %19 : vector<1x16x256xbf16> to vector<16x256xbf16>
    %cst_13 = arith.constant dense<0.000000e+00> : vector<16x256xf32>
    %21 = tpu.matmul %20, %15, %cst_13 {dimension_numbers = #tpu.dot_dimension_numbers<[1], [1], [0], [0], [0, 0, 1, 0], [], []>} : vector<16x256xbf16>, vector<256x256xbf16>, vector<16x256xf32> -> vector<16x256xf32>
    %c0_14 = arith.constant 0 : index
    %c0_15 = arith.constant 0 : index
    %c0_16 = arith.constant 0 : index
    %22 = vector.load %arg6[%c0_14, %c0_15, %c0_16] : memref<1x16x256xf32, #tpu.memory_space<vmem>>, vector<1x16x256xf32>
    %23 = vector.shape_cast %22 : vector<1x16x256xf32> to vector<16x256xf32>
    %c0_17 = arith.constant 0 : index
    %24 = memref.load %arg2[%c0_17] : memref<1xf32, #tpu.memory_space<smem>>
    %25 = vector.broadcast %24 : f32 to vector<16x256xf32>
    %26 = arith.mulf %25, %21 : vector<16x256xf32>
    %27 = arith.addf %23, %26 : vector<16x256xf32>
    %c0_18 = arith.constant 0 : index
    %c0_19 = arith.constant 0 : index
    %c0_20 = arith.constant 0 : index
    %28 = vector.load %arg7[%c0_18, %c0_19, %c0_20] : memref<1x16x256xf32, #tpu.memory_space<vmem>>, vector<1x16x256xf32>
    %29 = vector.shape_cast %28 : vector<1x16x256xf32> to vector<16x256xf32>
    %30 = vector.shape_cast %27 : vector<16x256xf32> to vector<1x16x256xf32>
    tpu.vector_store %arg7[%c0_18, %c0_19, %c0_20], %30 {strides = array<i32>} : memref<1x16x256xf32, #tpu.memory_space<vmem>>, vector<1x16x256xf32>,
    return
  }
  func.func @transform_0(%arg0: i32, %arg1: i32, %arg2: memref<1xf32, #tpu.memory_space<smem>>) -> (i32, i32, i32) {
    %c0_i32 = arith.constant 0 : i32
    %c0_i32_0 = arith.constant 0 : i32
    %c0_i32_1 = arith.constant 0 : i32
    return %arg0, %c0_i32, %c0_i32_0 : i32, i32, i32
  }
  func.func @transform_1(%arg0: i32, %arg1: i32, %arg2: memref<1xf32, #tpu.memory_space<smem>>) -> (i32, i32, i32) {
    %c0_i32 = arith.constant 0 : i32
    %c0_i32_0 = arith.constant 0 : i32
    return %arg0, %c0_i32, %arg1 : i32, i32, i32
  }
  func.func @transform_2(%arg0: i32, %arg1: i32, %arg2: memref<1xf32, #tpu.memory_space<smem>>) -> (i32, i32, i32) {
    %c0_i32 = arith.constant 0 : i32
    %c0_i32_0 = arith.constant 0 : i32
    %c0_i32_1 = arith.constant 0 : i32
    return %arg0, %c0_i32, %c0_i32_0 : i32, i32, i32
  }
  func.func @transform_3(%arg0: i32, %arg1: i32, %arg2: memref<1xf32, #tpu.memory_space<smem>>) -> (i32, i32, i32) {
    %c0_i32 = arith.constant 0 : i32
    %c0_i32_0 = arith.constant 0 : i32
    return %arg0, %c0_i32, %arg1 : i32, i32, i32
  }
  func.func @transform_4(%arg0: i32, %arg1: i32, %arg2: memref<1xf32, #tpu.memory_space<smem>>) -> (i32, i32, i32) {
    %c0_i32 = arith.constant 0 : i32
    %c0_i32_0 = arith.constant 0 : i32
    return %arg0, %c0_i32, %arg1 : i32, i32, i32
  }
  func.func @transform_5(%arg0: i32, %arg1: i32, %arg2: memref<1xf32, #tpu.memory_space<smem>>) -> (i32, i32, i32) {
    %c0_i32 = arith.constant 0 : i32
    %c0_i32_0 = arith.constant 0 : i32
    return %arg0, %arg1, %c0_i32 : i32, i32, i32
  }
}

</mosaic_0001>

<bundles_post_ra>
// kernel: tpu_custom_call.1
= control target key start
LH: loop header
LB: loop body
LE: loop exit
PB: predicated region body
PF: predicated region fallthrough
CT: control target
= control target key end

     0   :  { %s3268_s0 = inlined_call_operand.<no memory space> [shape: f32[1], index: 0, kind: input, shape index: {}]   ;;  %s3269_s1 = inlined_call_operand.hbm [shape: bf16[2,2,256], index: 1, kind: input, shape index: {}]   ;;  %s3270_s2 = inlined_call_operand.hbm [shape: bf16[2,2,256], index: 2, kind: input, shape index: {}]   ;;  %s3271_s3 = inlined_call_operand.hbm [shape: bf16[2,16,256], index: 3, kind: input, shape index: {}]   ;;  %s3272_s4 = inlined_call_operand.hbm [shape: f32[2,16,256], index: 4, kind: input, shape index: {}]   ;;  %s3273_s5 = inlined_call_operand.hbm [shape: f32[2,16,256], index: 5, kind: output, shape index: {0}]   ;;  %s3274_s6 = inlined_call_operand.hbm [shape: bf16[2,256,256], index: 6, kind: output, shape index: {1}]  }
   0x1   :  { %3303 = sst [smem:[#allocation39_spill]] %s3269_s1 }
   0x2   :  { %3304 = sst [smem:[#allocation40_spill]] %s3270_s2 }
   0x3   :  { %3305 = sst [smem:[#allocation41_spill]] %s3271_s3 }
   0x4   :  { %12 = sst [smem:[#allocation3]] %s3268_s0 }
   0x5   :  { %13 = vsyncpa [#allocation5], 0 }
   0x6   :  { %15 = vsyncpa [#allocation5 + $0x1], 0 }
   0x7   :  { %16 = vsyncpa [#allocation8], 0 }
   0x8   :  { %18 = vsyncpa [#allocation8 + $0x1], 0 }
   0x9   :  { %19 = vsyncpa [#allocation11], 0 }
   0xa   :  { %21 = vsyncpa [#allocation11 + $0x1], 0 }
   0xb   :  { %22 = vsyncpa [#allocation6], 0 }
   0xc   :  { %24 = vsyncpa [#allocation6 + $0x1], 0 }
   0xd   :  { %25 = vsyncpa [#allocation14], 0 }
   0xe   :  { %27 = vsyncpa [#allocation14 + $0x1], 0  ;;  %s2432_s23 = smov 0   ;;  %s2434_s24 = smov 0  }
   0xf   :  { %s2436_s25 = smov 0   ;;  %s2438_s26 = smov 0  }
  0x10   :  { %s2440_s27 = smov 0   ;;  %s2442_s0 = smov 0  }
  0x11 LB: > { %3306 = sst [smem:[#allocation20_spill]] %s2364_s25  ;;  %s2463_s28 = sadd.s32 4294967295, %s2376_s0   ;;  %s2376_s0 = sphi %s2442_s0, %s33_s0   ;;  %s2372_s27 = sphi %s2440_s27, %s3377_s27   ;;  %s2368_s26 = sphi %s2438_s26, %s3376_s26   ;;  %s2364_s25 = sphi %s2436_s25, %s3372_s25   ;;  %s2360_s24 = sphi %s2434_s24, %s3375_s24   ;;  %s2356_s23 = sphi %s2432_s23, %s3374_s23  }
  0x12   : > { %s1738_s29 = sadd.s32 4294967294, %s2376_s0   ;;  %s45_s30 = sadd.s32 1, %s2372_s27 }
  0x13   : > { %s52_s7 = sadd.s32 1, %s2364_s25  ;;  %p47_p0 = scmp.ge.s32.totalorder %s45_s30, 2 }
  0x14   : > { %p59_p1 = scmp.ne.s32.totalorder %s2364_s25, %s2360_s24  ;;  %p60_p2 = scmp.eq.s32.totalorder %s2376_s0, 0 }
  0x15   : > { %p65_p3 = scmp.ne.s32.totalorder %s2360_s24, %s2356_s23  ;;  %s3379_s30 = smov (%p47_p0, %s45_s30), 0 }
  0x16   : > { %3307 = sst [smem:[#allocation21_spill]] %s3379_s30  ;;  %p2475_p4 = por %p60_p2, %p59_p1 }
  0x17   : > { %p66_p5 = scmp.eq.s32.totalorder %s2463_s28, 0  ;;  %s49_s9 = ssub.s32 %s2372_s27, %s3379_s30 }
  0x18   : > { %p173_p6 = scmp.eq.s32.totalorder %s2463_s28, 1  ;;  %p50_p7 = scmp.eq.s32.totalorder %s49_s9, 0 }
  0x19   : > { %p2483_p8 = por %p66_p5, %p65_p3  ;;  %p179_p10 = scmp.eq.s32.totalorder %s1738_s29, 1 }
  0x1a   : > { %p2487_p9 = por %p173_p6, %p59_p1  ;;  %p1891_p13 = scmp.lt.s32.totalorder %s2376_s0, 2 }
  0x1b   : > { %s2492_s12 = scalar_select %p50_p7, %s2364_s25, %s52_s7  }
  0x1c   : > { %p2494_p11 = por %p179_p10, %p65_p3  ;;  %s2501_s14 = sand.u32 1, %s2364_s25  }
  0x1d   : > { %3311 = sst [smem:[#allocation22_spill]] %s2492_s12  ;;  %s1741_s15 = sshll.u32 %s2501_s14, 1 }
  0x1e   : > { %s1821_s16 = sshll.u32 %s2372_s27, 5  ;;  %p2507_p0 = pnand %p1891_p13, %p2475_p4 }
  0x1f   : > { %s246_s18 = sand.u32 1, %s2376_s0   ;;  %s3314_s2 = sld [smem:[#allocation40_spill]] }
  0x20   : > { %s250_s22 = scalar_lea.vmem [#allocation7], %s1741_s15  ;;  %p1753_p1 = scmp.ge.s32.totalorder %s2376_s0, 1 }
  0x21   : > { %s260_s29 = sshll.u32 %s250_s22, 4  ;;  %p309_p2 = scmp.lt.s32.totalorder %s2376_s0, 3  ;;  %s261_s29 = int_to_ptr.vmem [resolvable:$true] %s260_s29 }
  0x22   : > { %s2517_s7 = scalar_lea.sflag [#allocation8], %s246_s18  ;;  %p2148_p3 = pneg %p2507_p0 }
  0x23   : > { %s2159_s8 = scalar_lea.vmem %s261_s29, 32  ;;  %s2378_s9 = smov [#allocation7]  }
  0x24   : > { %p2160_p4 = scmp.ne.s32.totalorder %s261_s29, %s2159_s8  ;;  %s2164_s30 = sshll.u32 %s2378_s9, 4  ;;  %s2165_s30 = int_to_ptr.vmem [resolvable:$false] %s2164_s30 }
  0x25   : > { %s258_s21 = scalar_lea.hbm %s3314_s2, %s1821_s16  ;;  %s2166_s19 = scalar_lea.vmem %s2165_s30, 64 }
  0x26   : > { %p2162_p5 = pnand %p2160_p4, %p2148_p3  ;;  %p2167_p7 = scmp.lt.s32.totalorder %s261_s29, %s2165_s30 }
  0x27   : > { %p2168_p10 = scmp.lt.s32.totalorder %s2166_s19, %s2159_s8 }
  0x28   : > { %p2163_p6 = pneg %p2162_p5 }
  0x29   : > { %p2169_p13 = por %p2168_p10, %p2167_p7 }
  0x2b   : > { %p2170_p12 = pnand %p2169_p13, %p2163_p6 }
  0x2d   : > { %2173 = shalt.err (!%p2170_p12)
}
  0x2e   : > { %1877 = dma.hbm_to_vmem [thread:$0]  (!%p2507_p0), %s258_s21, 32, %s261_s29, %s2517_s7  }
  0x2f   : > { %p2531_p4 = pnand %p1753_p1, %p309_p2  ;;  %s3316_s1 = sld [smem:[#allocation39_spill]] }
  0x30   : > { %s231_s8 = scalar_lea.vmem [#allocation4], %s1741_s15  ;;  %s1747_s19 = sshll.u32 %s2501_s14, 4 }
  0x31   : > { %s239_s9 = sshll.u32 %s231_s8, 4  ;;  %s228_s2 = scalar_lea.sflag [#allocation5], %s2501_s14  ;;  %s240_s9 = int_to_ptr.vmem [resolvable:$true] %s239_s9 }
  0x32   : > { %s2187_s12 = scalar_lea.vmem %s240_s9, 32  ;;  %s2379_s21 = smov [#allocation4]  }
  0x33   : > { %p2188_p12 = scmp.ne.s32.totalorder %s240_s9, %s2187_s12  ;;  %s2192_s29 = sshll.u32 %s2379_s21, 4  ;;  %s2193_s29 = int_to_ptr.vmem [resolvable:$false] %s2192_s29 }
  0x34   : > { %s2194_s25 = scalar_lea.vmem %s2193_s29, 64  ;;  %p2195_p1 = scmp.lt.s32.totalorder %s240_s9, %s2193_s29 }
  0x35   : > { %s237_s22 = scalar_lea.hbm %s3316_s1, %s1821_s16  ;;  %p2190_p5 = pnand %p2188_p12, %p2148_p3 }
  0x36   : > { %p2196_p2 = scmp.lt.s32.totalorder %s2194_s25, %s2187_s12 }
  0x37   : > { %p2191_p6 = pneg %p2190_p5 }
  0x38   : > { %p2197_p7 = por %p2196_p2, %p2195_p1 }
  0x3a   : > { %p2198_p10 = pnand %p2197_p7, %p2191_p6 }
  0x3c   : > { %2201 = shalt.err (!%p2198_p10)
}
  0x3d   : > { %1874 = dma.hbm_to_vmem [thread:$0]  (!%p2507_p0), %s237_s22, 32, %s240_s9, %s228_s2  }
  0x3e   : > { %s1823_s15 = sshll.u32 %s2372_s27, 8  ;;  %s271_s16 = scalar_lea.vmem [#allocation9], %s1747_s19 }
  0x3f   : > { %s278_s30 = sshll.u32 %s271_s16, 4  ;;  %s3317_s3 = sld [smem:[#allocation41_spill]]  ;;  %s279_s30 = int_to_ptr.vmem [resolvable:$true] %s278_s30 }
  0x40   : > { %s2215_s21 = scalar_lea.vmem %s279_s30, 256  ;;  %s2380_s25 = smov [#allocation9]  }
  0x41   : > { %p2216_p13 = scmp.ne.s32.totalorder %s279_s30, %s2215_s21  ;;  %s2220_s12 = sshll.u32 %s2380_s25, 4  ;;  %s2221_s12 = int_to_ptr.vmem [resolvable:$false] %s2220_s12 }
  0x42   : > { %s2222_s29 = scalar_lea.vmem %s2221_s12, 512  ;;  %p2223_p6 = scmp.lt.s32.totalorder %s279_s30, %s2221_s12 }
  0x43   : > { %p2218_p12 = pnand %p2216_p13, %p2148_p3  ;;  %p2224_p1 = scmp.lt.s32.totalorder %s2222_s29, %s2215_s21 }
  0x45   : > { %s277_s1 = scalar_lea.hbm %s3317_s3, %s1823_s15  ;;  %p2219_p5 = pneg %p2218_p12 }
  0x46   : > { %p2225_p2 = por %p2224_p1, %p2223_p6 }
  0x48   : > { %p2226_p7 = pnand %p2225_p2, %p2219_p5 }
  0x4a   : > { %2229 = shalt.err (!%p2226_p7)
}
  0x4b   : > { %s2381_s2 = smov 128   ;;  %s2382_s22 = smov 8  }
  0x4c   : > { %1880 = dma.hbm_to_vmem [thread:$0]  (!%p2507_p0), %s277_s1, 256, %s279_s30, %s2517_s7, %s2381_s2, %s2381_s2, %s2382_s22  }
  0x4d   : > { %s1750_s9 = sshll.u32 %s2501_s14, 5  ;;  %s1824_s19 = sshll.u32 %s2372_s27, 9 }
  0x4e   : > { %s300_s20 = scalar_lea.hbm %s3272_s4, %s1824_s19  ;;  %s292_s8 = scalar_lea.vmem [#allocation10], %s1750_s9 }
  0x4f   : > { %s301_s21 = sshll.u32 %s292_s8, 4  ;;  %s289_s25 = scalar_lea.sflag [#allocation11], %s2501_s14  ;;  %s302_s21 = int_to_ptr.vmem [resolvable:$true] %s301_s21 }
  0x50   : > { %s2243_s12 = scalar_lea.vmem %s302_s21, 512  ;;  %s2383_s29 = smov [#allocation10]  }
  0x51   : > { %p2244_p10 = scmp.ne.s32.totalorder %s302_s21, %s2243_s12  ;;  %s2248_s3 = sshll.u32 %s2383_s29, 4  ;;  %s2249_s3 = int_to_ptr.vmem [resolvable:$false] %s2248_s3 }
  0x52   : > { %s2250_s1 = scalar_lea.vmem %s2249_s3, 1024  ;;  %p2251_p5 = scmp.lt.s32.totalorder %s302_s21, %s2249_s3 }
  0x53   : > { %p2246_p13 = pnand %p2244_p10, %p2148_p3  ;;  %p2252_p6 = scmp.lt.s32.totalorder %s2250_s1, %s2243_s12 }
  0x55   : > { %p2247_p12 = pneg %p2246_p13  ;;  %p2253_p1 = por %p2252_p6, %p2251_p5 }
  0x57   : > { %p2254_p2 = pnand %p2253_p1, %p2247_p12 }
  0x59   : > { %2257 = shalt.err (!%p2254_p2)
}
  0x5a   : > { %s2384_s7 = smov 256   ;;  %s2385_s30 = smov 16  }
  0x5b   : > { %1883 = dma.hbm_to_vmem [thread:$0]  (!%p2507_p0), %s300_s20, 512, %s302_s21, %s289_s25, %s2384_s7, %s2384_s7, %s2385_s30  }
  0x5c   : > { %313 = sbr.rel (%p2531_p4) target bundleno = 1200 (0x4b0), region = 36 }
  0x61   : > { %s2569_s14 = sand.u32 1, %s2360_s24  }
  0x62   : > { %s1754_s2 = sshll.u32 %s2569_s14, 1  ;;  %s316_s3 = scalar_lea.sflag [#allocation5], %s2569_s14 }
  0x63   : > { %s319_s22 = scalar_lea.vmem [#allocation4], %s1754_s2 }
  0x64   : > { %2335 = dma.done.wait (%p2483_p8), %s316_s3, 32  }
  0x65   : > { %2337 = vsyncadd (%p2483_p8), %s316_s3, 4294967264  ;;  %s324_s17 = sand.u32 1, %s2463_s28   ;;  %s328_s18 = scalar_lea.vmem [#allocation7], %s1754_s2 }
  0x66   : > { %s325_s9 = scalar_lea.sflag [#allocation8], %s324_s17 }
  0x67   : > { %2339 = dma.done.wait (%p2483_p8), %s325_s9, 288  }
  0x68   : > { %2341 = vsyncadd (%p2483_p8), %s325_s9, 4294967008  ;;  %s1756_s19 = sshll.u32 %s2569_s14, 4  ;;  %s1757_s15 = sshll.u32 %s2569_s14, 5 }
  0x69   : > { %s2584_s16 = scalar_lea.vmem [#allocation9], %s1756_s19  ;;  %s343_s20 = scalar_lea.sflag [#allocation11], %s2569_s14 }
  0x6a   : > { %s2589_s8 = scalar_lea.vmem [#allocation10], %s1757_s15 }
  0x6b   : > { %2343 = dma.done.wait (%p2483_p8), %s343_s20, 512  }
  0x6c   : > { %2345 = vsyncadd (%p2483_p8), %s343_s20, 4294966784  ;;  %v412_v0 = vlaneseq  ;;  %v2386_v1 = vmov 1966171168   ;;  %v2387_v3 = vmov 0   ;;  %vm529_vm0 = vcmask 1040384   ;;  %s1759_s28 = sshll.u32 %s2569_s14, 8 }
  0x6d   : > { %v410_v2 = vunpack.c.l.s4 %v2386_v1  ;;  %568 = vmatprep.mubr.bf16.mxu0 %v2387_v3  ;;  %v1760_v7 = vld.sshfl [vmem:[%s328_s18] sm:$0x11 pattern:$0x75316420]  ;;  %vm480_vm1 = vcmask 15360   ;;  %s3024_s10 = scalar_lea.vmem [#allocation13], %s1759_s28 }
  0x6e   : > { %v413_v4 = vshrl.u32 %v412_v0, 7  ;;  %v1761_v9 = vld.sshfl [vmem:[%s319_s22] sm:$0x11 pattern:$0x75316420]  ;;  %v408_v14 = vcombine.high %v1760_v7, %v1760_v7  ;;  %s1858_s21 = sshll.u32 %s2368_s26, 12 }
  0x6f   : > { %v411_v5 = vunpack.c.0.s8 %v410_v2  ;;  %v465_v10 = vcombine.high %v1761_v9, %v1761_v9  ;;  %s1546_s25 = sshll.u32 %s3024_s10, 4  ;;  %s3181_s1 = scalar_lea.hbm %s3274_s6, %s1858_s21  ;;  %s3183_s25 = int_to_ptr.vmem [resolvable:$true] %s1546_s25 }
  0x70   : > { %s1512_s7 = scalar_lea.sflag [#allocation14], %s2569_s14  ;;  %s2258_s30 = scalar_lea.vmem %s3183_s25, 4096 }
  0x71   : > { %v414_v6 = vsub.s32 %v411_v5, %v413_v4  ;;  %p2259_p8 = scmp.ne.s32.totalorder %s3183_s25, %s2258_s30  ;;  %s2388_s2 = smov [#allocation13]  }
  0x72   : > { %s2262_s3 = sshll.u32 %s2388_s2, 4  ;;  %s2263_s3 = int_to_ptr.vmem [resolvable:$false] %s2262_s3 }
  0x73   : > { %v415_v8 = vrot.slane %v1760_v7, %v414_v6  ;;  %v472_v11 = vrot.slane %v1761_v9, %v414_v6  ;;  %v479_v12 = vrot.slane %v465_v10, %v414_v6  ;;  %v422_v15 = vrot.slane %v408_v14, %v414_v6  ;;  %p2260_p0 = pnand %p2259_p8, %p2487_p9  ;;  %s2264_s22 = scalar_lea.vmem %s2263_s3, 8192 }
  0x74   : > { %p2265_p4 = scmp.lt.s32.totalorder %s3183_s25, %s2263_s3  ;;  %p2266_p7 = scmp.lt.s32.totalorder %s2264_s22, %s2258_s30 }
  0x75   : > { %425 = vxpose.xlu0.c.b16.start.end [1/1] (short) %v415_v8, 128  ;;  %v531_v13 = vsel %vm529_vm0, %v472_v11, 0  ;;  %1762 = vmatprep.subr.msk.bf16.mxu0 %vm529_vm0, %v479_v12  ;;  %p2261_p3 = pneg %p2260_p0 }
  0x76   : > { %551 = vmatpush1.bf16.msra.mxu0 %v531_v13  ;;  %p2267_p10 = por %p2266_p7, %p2265_p4 }
  0x78   : > { %p2268_p13 = pnand %p2267_p10, %p2261_p3 }
  0x92   : > { %441 = vxpose.xlu0.c.b16.start.end [1/1] (short) %v422_v15, 128 }
  0xd7   : > { %v433_v16 = vpop.trf.xlu0 }
  0xd8   : > { %1763 = vmatmul.mubr.msk.bf16.vlgmr.msra.gmra.mxu0 %vm480_vm1, %v433_v16 }
  0xd9   : > { %578 = vmatprep.mubr.bf16.mxu0 %v2387_v3 }
  0xdb   : > { %v434_v17 = vpop.trf.xlu0 }
  0xdf   : > { %v435_v18 = vpop.trf.xlu0 }
  0xe0   : > { %1764 = vmatmul.mubr.msk.bf16.gmra.mxu0 %vm480_vm1, %v434_v17 }
  0xe1   : > { %588 = vmatprep.mubr.bf16.mxu0 %v2387_v3 }
  0xe3   : > { %v436_v19 = vpop.trf.xlu0 }
  0xe7   : > { %v437_v20 = vpop.trf.xlu0 }
  0xe8   : > { %1765 = vmatmul.mubr.msk.bf16.gmra.mxu0 %vm480_vm1, %v435_v18 }
  0xe9   : > { %598 = vmatprep.mubr.bf16.mxu0 %v2387_v3 }
  0xeb   : > { %v438_v21 = vpop.trf.xlu0 }
  0xef   : > { %v439_v22 = vpop.trf.xlu0 }
  0xf0   : > { %1766 = vmatmul.mubr.msk.bf16.gmra.mxu0 %vm480_vm1, %v436_v19 }
  0xf1   : > { %608 = vmatprep.mubr.bf16.mxu0 %v2387_v3 }
  0xf3   : > { %v440_v23 = vpop.trf.xlu0 }
  0xf7   : > { %v449_v24 = vpop.trf.xlu0 }
  0xf8   : > { %1767 = vmatmul.mubr.msk.bf16.gmra.mxu0 %vm480_vm1, %v437_v20 }
  0xf9   : > { %618 = vmatprep.mubr.bf16.mxu0 %v2387_v3 }
  0xfb   : > { %v450_v25 = vpop.trf.xlu0 }
  0xff   : > { %v451_v26 = vpop.trf.xlu0 }
 0x100   : > { %1768 = vmatmul.mubr.msk.bf16.gmra.mxu0 %vm480_vm1, %v438_v21 }
 0x101   : > { %628 = vmatprep.mubr.bf16.mxu0 %v2387_v3 }
 0x103   : > { %v452_v27 = vpop.trf.xlu0 }
 0x107   : > { %v453_v28 = vpop.trf.xlu0 }
 0x108   : > { %1769 = vmatmul.mubr.msk.bf16.gmra.mxu0 %vm480_vm1, %v439_v22 }
 0x109   : > { %638 = vmatprep.mubr.bf16.mxu0 %v2387_v3 }
 0x10b   : > { %v454_v29 = vpop.trf.xlu0 }
 0x10f   : > { %v455_v30 = vpop.trf.xlu0 }
 0x110   : > { %1770 = vmatmul.mubr.msk.bf16.gmra.mxu0 %vm480_vm1, %v440_v23 }
 0x111   : > { %648 = vmatprep.mubr.bf16.mxu0 %v2387_v3 }
 0x113   : > { %v456_v31 = vpop.trf.xlu0 }
 0x118   : > { %1771 = vmatmul.mubr.msk.bf16.gmra.mxu0 %vm480_vm1, %v449_v24 }
 0x119   : > { %658 = vmatprep.mubr.bf16.mxu0 %v2387_v3 }
 0x120   : > { %1772 = vmatmul.mubr.msk.bf16.gmra.mxu0 %vm480_vm1, %v450_v25 }
 0x121   : > { %668 = vmatprep.mubr.bf16.mxu0 %v2387_v3 }
 0x128   : > { %1773 = vmatmul.mubr.msk.bf16.gmra.mxu0 %vm480_vm1, %v451_v26 }
 0x129   : > { %678 = vmatprep.mubr.bf16.mxu0 %v2387_v3 }
 0x130   : > { %1774 = vmatmul.mubr.msk.bf16.gmra.mxu0 %vm480_vm1, %v452_v27 }
 0x131   : > { %688 = vmatprep.mubr.bf16.mxu0 %v2387_v3 }
 0x138   : > { %1775 = vmatmul.mubr.msk.bf16.gmra.mxu0 %vm480_vm1, %v453_v28 }
 0x139   : > { %698 = vmatprep.mubr.bf16.mxu0 %v2387_v3 }
 0x140   : > { %1776 = vmatmul.mubr.msk.bf16.gmra.mxu0 %vm480_vm1, %v454_v29 }
 0x141   : > { %708 = vmatprep.mubr.bf16.mxu0 %v2387_v3 }
 0x148   : > { %1777 = vmatmul.mubr.msk.bf16.gmra.mxu0 %vm480_vm1, %v455_v30 }
 0x149   : > { %718 = vmatprep.mubr.bf16.mxu0 %v2387_v3 }
 0x150   : > { %1778 = vmatmul.mubr.msk.bf16.gmra.mxu0 %vm480_vm1, %v456_v31 }
 0x198   : > { %v2627_v32 = vpop.f32.mrf.mxu0 }
 0x19a   : > { %v2629_v33 = vpop.f32.mrf.mxu0 }
 0x19c   : > { %v2631_v34 = vpop.f32.mrf.mxu0 }
 0x19e   : > { %v2633_v35 = vpop.f32.mrf.mxu0 }
 0x1a0   : > { %v2635_v36 = vpop.f32.mrf.mxu0 }
 0x1a2   : > { %v2637_v37 = vpop.f32.mrf.mxu0 }
 0x1a4   : > { %v2639_v38 = vpop.f32.mrf.mxu0 }
 0x1a6   : > { %v2641_v39 = vpop.f32.mrf.mxu0 }
 0x1a8   : > { %v2643_v40 = vpop.f32.mrf.mxu0 }
 0x1aa   : > { %v2645_v41 = vpop.f32.mrf.mxu0 }
 0x1ab   : > { %v741_v26 = vmax.f32 %v2643_v40, %v2645_v41 }
 0x1ac   : > { %v2647_v42 = vpop.f32.mrf.mxu0 }
 0x1ae   : > { %v2649_v43 = vpop.f32.mrf.mxu0 }
 0x1af   : > { %v744_v29 = vmax.f32 %v2647_v42, %v2649_v43 }
 0x1b0   : > { %v2651_v44 = vpop.f32.mrf.mxu0 }
 0x1b2   : > { %v2653_v45 = vpop.f32.mrf.mxu0 }
 0x1b3   : > { %v747_v23 = vmax.f32 %v2651_v44, %v2653_v45 }
 0x1b4   : > { %v2655_v46 = vpop.f32.mrf.mxu0 }
 0x1b6   : > { %v2657_v47 = vpop.f32.mrf.mxu0 }
 0x1b7   : > { %v750_v48 = vmax.f32 %v2655_v46, %v2657_v47 }
 0x1b8   : > { %v2661_v49 = vpop.f32.mrf.mxu0 }
 0x1b9   : > { %751 = vmax.xlane.f32.xlu0 %v750_v48  ;;  %v735_v48 = vmax.f32 %v2635_v36, %v2637_v37 }
 0x1ba   : > { %v2663_v50 = vpop.f32.mrf.mxu0 }
 0x1bb   : > { %v753_v17 = vmax.f32 %v2661_v49, %v2663_v50 }
 0x1bc   : > { %v2665_v51 = vpop.f32.mrf.mxu0 }
 0x1be   : > { %v2667_v52 = vpop.f32.mrf.mxu0 }
 0x1bf   : > { %v756_v20 = vmax.f32 %v2665_v51, %v2667_v52 }
 0x1c0   : > { %v2669_v53 = vpop.f32.mrf.mxu0 }
 0x1c2   : > { %v2671_v54 = vpop.f32.mrf.mxu0 }
 0x1c3   : > { %v759_v11 = vmax.f32 %v2669_v53, %v2671_v54 }
 0x1c4   : > { %v2673_v55 = vpop.f32.mrf.mxu0 }
 0x1c6   : > { %v2675_v56 = vpop.f32.mrf.mxu0 }
 0x1c7   : > { %v762_v14 = vmax.f32 %v2673_v55, %v2675_v56 }
 0x1c8   : > { %v2677_v57 = vpop.f32.mrf.mxu0 }
 0x1ca   : > { %v2679_v58 = vpop.f32.mrf.mxu0 }
 0x1cb   : > { %v765_v5 = vmax.f32 %v2677_v57, %v2679_v58 }
 0x1cc   : > { %v2681_v59 = vpop.f32.mrf.mxu0 }
 0x1ce   : > { %v2683_v60 = vpop.f32.mrf.mxu0 }
 0x1cf   : > { %v768_v8 = vmax.f32 %v2681_v59, %v2683_v60 }
 0x1d0   : > { %v2685_v61 = vpop.f32.mrf.mxu0 }
 0x1d2   : > { %v2687_v62 = vpop.f32.mrf.mxu0 }
 0x1d3   : > { %v771_v63 = vmax.f32 %v2685_v61, %v2687_v62 }
 0x1d4   : > { %v2691_v0 = vpop.f32.mrf.mxu0 }
 0x1d5   : > { %772 = vmax.xlane.f32.xlu1 %v771_v63 }
 0x1d6   : > { %v2693_v1 = vpop.f32.mrf.mxu0 }
 0x1d7   : > { %v774_v2 = vmax.f32 %v2691_v0, %v2693_v1 }
 0x1d8   : > { %v2697_v3 = vpop.f32.mrf.mxu0 }
 0x1d9   : > { %775 = vmax.xlane.f32.xlu1 %v774_v2 }
 0x1da   : > { %v2699_v4 = vpop.f32.mrf.mxu0 }
 0x1dc   : > { %v2703_v6 = vpop.f32.mrf.mxu0 }
 0x1dd   : > { %766 = vmax.xlane.f32.xlu1 %v765_v5  ;;  %v738_v5 = vmax.f32 %v2639_v38, %v2641_v39 }
 0x1de   : > { %v2705_v7 = vpop.f32.mrf.mxu0 }
 0x1e0   : > { %v2709_v9 = vpop.f32.mrf.mxu0 }
 0x1e1   : > { %769 = vmax.xlane.f32.xlu1 %v768_v8 }
 0x1e2   : > { %v2711_v10 = vpop.f32.mrf.mxu0 }
 0x1e4   : > { %v2715_v12 = vpop.f32.mrf.mxu0 }
 0x1e5   : > { %760 = vmax.xlane.f32.xlu1 %v759_v11 }
 0x1e6   : > { %v2717_v13 = vpop.f32.mrf.mxu0 }
 0x1e8   : > { %v2721_v15 = vpop.f32.mrf.mxu0 }
 0x1e9   : > { %763 = vmax.xlane.f32.xlu1 %v762_v14 }
 0x1ea   : > { %v2723_v16 = vpop.f32.mrf.mxu0 }
 0x1ec   : > { %v2727_v18 = vpop.f32.mrf.mxu0 }
 0x1ed   : > { %754 = vmax.xlane.f32.xlu1 %v753_v17 }
 0x1ee   : > { %v2729_v19 = vpop.f32.mrf.mxu0 }
 0x1f0   : > { %v2733_v21 = vpop.f32.mrf.mxu0 }
 0x1f1   : > { %757 = vmax.xlane.f32.xlu1 %v756_v20  ;;  %v729_v20 = vmax.f32 %v2627_v32, %v2629_v33 }
 0x1f2   : > { %v2735_v22 = vpop.f32.mrf.mxu0 }
 0x1f4   : > { %v2739_v24 = vpop.f32.mrf.mxu0 }
 0x1f5   : > { %748 = vmax.xlane.f32.xlu1 %v747_v23 }
 0x1f6   : > { %v2741_v25 = vpop.f32.mrf.mxu0 }
 0x1f8   : > { %v2745_v27 = vpop.f32.mrf.mxu0 }
 0x1f9   : > { %3318 = vst [vmem:[#allocation23_spill] sm:$0xff] %v2745_v27  ;;  %742 = vmax.xlane.f32.xlu1 %v741_v26 }
 0x1fa   : > { %v2747_v28 = vpop.f32.mrf.mxu0 }
 0x1fb   : > { %3319 = vst [vmem:[#allocation24_spill] sm:$0xff] %v2747_v28  ;;  %v801_v14 = vmax.f32 %v2745_v27, %v2747_v28 }
 0x1fc   : > { %v2751_v30 = vpop.f32.mrf.mxu0 }
 0x1fd   : > { %745 = vmax.xlane.f32.xlu1 %v744_v29  ;;  %v732_v29 = vmax.f32 %v2631_v34, %v2633_v35 }
 0x1fe   : > { %v2753_v31 = vpop.f32.mrf.mxu0 }
 0x1ff   : > { %3320 = vst [vmem:[#allocation25_spill] sm:$0xff] %v2753_v31 }
 0x200   : > { %v2757_v63 = vpop.f32.mrf.mxu0 }
 0x201   : > { %3321 = vst [vmem:[#allocation26_spill] sm:$0xff] %v2757_v63  ;;  %736 = vmax.xlane.f32.xlu1 %v735_v48 }
 0x202   : > { %v2759_v2 = vpop.f32.mrf.mxu0 }
 0x203   : > { %3322 = vst [vmem:[#allocation27_spill] sm:$0xff] %v2759_v2  ;;  %v807_v8 = vmax.f32 %v2757_v63, %v2759_v2 }
 0x204   : > { %v2765_v11 = vpop.f32.mrf.mxu0 }
 0x205   : > { %3323 = vst [vmem:[#allocation28_spill] sm:$0xff] %v2765_v11  ;;  %739 = vmax.xlane.f32.xlu1 %v738_v5  ;;  %808 = vmax.xlane.f32.xlu0 %v807_v8 }
 0x206   : > { %v2769_v17 = vpop.f32.mrf.mxu0 }
 0x207   : > { %3324 = vst [vmem:[#allocation29_spill] sm:$0xff] %v2769_v17 }
 0x208   : > { %v2773_v23 = vpop.f32.mrf.mxu0 }
 0x209   : > { %730 = vmax.xlane.f32.xlu1 %v729_v20  ;;  %802 = vmax.xlane.f32.xlu0 %v801_v14 }
 0x20a   : > { %v2775_v26 = vpop.f32.mrf.mxu0 }
 0x20b   : > { %3325 = vst [vmem:[#allocation30_spill] sm:$0xff] %v2775_v26 }
 0x20c   : > { %v2779_v48 = vpop.f32.mrf.mxu0 }
 0x20d   : > { %733 = vmax.xlane.f32.xlu1 %v732_v29  ;;  %v813_v29 = vmax.f32 %v2773_v23, %v2775_v26 }
 0x20e   : > { %v2781_v5 = vpop.f32.mrf.mxu0 }
 0x20f   : > { %3326 = vst [vmem:[#allocation31_spill] sm:$0xff] %v2781_v5  ;;  %v816_v63 = vmax.f32 %v2779_v48, %v2781_v5 }
 0x210   : > { %v2783_v8 = vpop.f32.mrf.mxu0 }
 0x211   : > { %3327 = vst [vmem:[#allocation32_spill] sm:$0xff] %v2783_v8 }
 0x212   : > { %v2785_v28 = vpop.f32.mrf.mxu0 }
 0x213   : > { %3328 = vst [vmem:[#allocation33_spill] sm:$0xff] %v2785_v28  ;;  %v819_v27 = vmax.f32 %v2783_v8, %v2785_v28  ;;  %v810_v28 = vmax.f32 %v2765_v11, %v2769_v17 }
 0x214   : > { %v2789_v2 = vpop.f32.mrf.mxu0 }
 0x215   : > { %3329 = vst [vmem:[#allocation34_spill] sm:$0xff] %v2789_v2  ;;  %820 = vmax.xlane.f32.xlu1 %v819_v27  ;;  %v804_v27 = vmax.f32 %v2751_v30, %v2753_v31 }
 0x216   : > { %v2791_v14 = vpop.f32.mrf.mxu0 }
 0x217   : > { %3330 = vst [vmem:[#allocation35_spill] sm:$0xff] %v2791_v14  ;;  %v822_v20 = vmax.f32 %v2789_v2, %v2791_v14 }
 0x219   : > { %823 = vmax.xlane.f32.xlu1 %v822_v20 }
 0x21d   : > { %814 = vmax.xlane.f32.xlu1 %v813_v29 }
 0x221   : > { %817 = vmax.xlane.f32.xlu1 %v816_v63 }
 0x225   : > { %811 = vmax.xlane.f32.xlu1 %v810_v28 }
 0x229   : > { %805 = vmax.xlane.f32.xlu1 %v804_v27 }
 0x25e   : > { %v773_v8 = vpop.xlane.xlu1 %772 }
 0x25f   : > { %v853_v14 = vsub.f32 %v2685_v61, %v773_v8  ;;  %v854_v20 = vsub.f32 %v2687_v62, %v773_v8 }
 0x261   : > { %v945_v2 = vmul.f32 1.442695, %v853_v14  ;;  %v947_v26 = vmul.f32 1.442695, %v854_v20 }
 0x262   : > { %v776_v29 = vpop.xlane.xlu1 %775 }
 0x263   : > { %1954 = vpow2.f32 %v945_v2  ;;  %v855_v5 = vsub.f32 %v2691_v0, %v776_v29  ;;  %v856_v63 = vsub.f32 %v2693_v1, %v776_v29 }
 0x264   : > { %1956 = vpow2.f32 %v947_v26 }
 0x265   : > { %v949_v17 = vmul.f32 1.442695, %v855_v5  ;;  %v951_v28 = vmul.f32 1.442695, %v856_v63 }
 0x266   : > { %v767_v11 = vpop.xlane.xlu1 %766 }
 0x267   : > { %1958 = vpow2.f32 %v949_v17  ;;  %v849_v27 = vsub.f32 %v2677_v57, %v767_v11  ;;  %v850_v31 = vsub.f32 %v2679_v58, %v767_v11 }
 0x268   : > { %1960 = vpow2.f32 %v951_v28 }
 0x269   : > { %v937_v61 = vmul.f32 1.442695, %v849_v27  ;;  %v939_v62 = vmul.f32 1.442695, %v850_v31 }
 0x26a   : > { %v770_v8 = vpop.xlane.xlu1 %769 }
 0x26b   : > { %1962 = vpow2.f32 %v937_v61  ;;  %v851_v2 = vsub.f32 %v2681_v59, %v770_v8  ;;  %v852_v0 = vsub.f32 %v2683_v60, %v770_v8  ;;  %v795_v61 = vmax.f32 %v2733_v21, %v2735_v22 }
 0x26c   : > { %1964 = vpow2.f32 %v939_v62 }
 0x26d   : > { %v941_v1 = vmul.f32 1.442695, %v851_v2  ;;  %v943_v26 = vmul.f32 1.442695, %v852_v0 }
 0x26e   : > { %v761_v5 = vpop.xlane.xlu1 %760 }
 0x26f   : > { %1966 = vpow2.f32 %v941_v1  ;;  %v845_v17 = vsub.f32 %v2669_v53, %v761_v5  ;;  %v846_v57 = vsub.f32 %v2671_v54, %v761_v5 }
 0x270   : > { %v2813_v14 = vpop.eup %1954  ;;  %1968 = vpow2.f32 %v943_v26  ;;  %v752_v26 = vpop.xlane.xlu0 %751 }
 0x271   : > { %v2815_v58 = vpop.eup %1956  ;;  %v929_v31 = vmul.f32 1.442695, %v845_v17  ;;  %v931_v11 = vmul.f32 1.442695, %v846_v57  ;;  %v798_v57 = vmax.f32 %v2739_v24, %v2741_v25 }
 0x272   : > { %v764_v20 = vpop.xlane.xlu1 %763  ;;  %v1059_v59 = vadd.f32 %v2815_v58, %v2813_v14 }
 0x273   : > { %1970 = vpow2.f32 %v929_v31  ;;  %v847_v60 = vsub.f32 %v2673_v55, %v764_v20  ;;  %v848_v29 = vsub.f32 %v2675_v56, %v764_v20  ;;  %v839_v20 = vsub.f32 %v2655_v46, %v752_v26 }
 0x274   : > { %v2821_v63 = vpop.eup %1958  ;;  %1972 = vpow2.f32 %v931_v11  ;;  %1060 = vadd.xlane.f32.xlu0 %v1059_v59 }
 0x275   : > { %v2823_v53 = vpop.eup %1960  ;;  %v933_v54 = vmul.f32 1.442695, %v847_v60  ;;  %v935_v28 = vmul.f32 1.442695, %v848_v29  ;;  %v840_v29 = vsub.f32 %v2657_v47, %v752_v26  ;;  %v917_v47 = vmul.f32 1.442695, %v839_v20 }
 0x276   : > { %v755_v27 = vpop.xlane.xlu1 %754  ;;  %v1062_v62 = vadd.f32 %v2823_v53, %v2821_v63  ;;  %v783_v20 = vmax.f32 %v2709_v9, %v2711_v10 }
 0x277   : > { %1974 = vpow2.f32 %v933_v54  ;;  %v841_v55 = vsub.f32 %v2661_v49, %v755_v27  ;;  %v842_v56 = vsub.f32 %v2663_v50, %v755_v27 }
 0x278   : > { %v2831_v8 = vpop.eup %1962  ;;  %1976 = vpow2.f32 %v935_v28  ;;  %796 = vmax.xlane.f32.xlu0 %v795_v61  ;;  %1063 = vadd.xlane.f32.xlu1 %v1062_v62  ;;  %v789_v28 = vmax.f32 %v2721_v15, %v2723_v16 }
 0x279   : > { %v2833_v2 = vpop.eup %1964  ;;  %v921_v0 = vmul.f32 1.442695, %v841_v55  ;;  %v923_v1 = vmul.f32 1.442695, %v842_v56  ;;  %v919_v56 = vmul.f32 1.442695, %v840_v29 }
 0x27a   : > { %v758_v5 = vpop.xlane.xlu1 %757  ;;  %v1053_v17 = vadd.f32 %v2833_v2, %v2831_v8 }
 0x27b   : > { %1978 = vpow2.f32 %v921_v0  ;;  %v843_v49 = vsub.f32 %v2665_v51, %v758_v5  ;;  %v844_v50 = vsub.f32 %v2667_v52, %v758_v5 }
 0x27c   : > { %v2841_v31 = vpop.eup %1966  ;;  %1980 = vpow2.f32 %v923_v1  ;;  %1054 = vadd.xlane.f32.xlu0 %v1053_v17  ;;  %799 = vmax.xlane.f32.xlu1 %v798_v57 }
 0x27d   : > { %v2843_v11 = vpop.eup %1968  ;;  %v925_v59 = vmul.f32 1.442695, %v843_v49  ;;  %v927_v60 = vmul.f32 1.442695, %v844_v50 }
 0x27e   : > { %v749_v54 = vpop.xlane.xlu1 %748  ;;  %v1056_v51 = vadd.f32 %v2843_v11, %v2841_v31 }
 0x27f   : > { %1982 = vpow2.f32 %v925_v59  ;;  %v837_v52 = vsub.f32 %v2651_v44, %v749_v54  ;;  %v838_v27 = vsub.f32 %v2653_v45, %v749_v54  ;;  %v792_v44 = vmax.f32 %v2727_v18, %v2729_v19 }
 0x280   : > { %v2853_v61 = vpop.eup %1970  ;;  %1984 = vpow2.f32 %v927_v60  ;;  %790 = vmax.xlane.f32.xlu0 %v789_v28  ;;  %1057 = vadd.xlane.f32.xlu1 %v1056_v51 }
 0x281   : > { %v2855_v46 = vpop.eup %1972  ;;  %v913_v62 = vmul.f32 1.442695, %v837_v52  ;;  %v915_v55 = vmul.f32 1.442695, %v838_v27  ;;  %v786_v27 = vmax.f32 %v2715_v12, %v2717_v13 }
 0x282   : > { %v743_v0 = vpop.xlane.xlu1 %742  ;;  %v1047_v1 = vadd.f32 %v2855_v46, %v2853_v61 }
 0x283   : > { %1986 = vpow2.f32 %v913_v62  ;;  %v833_v45 = vsub.f32 %v2643_v40, %v743_v0  ;;  %v834_v26 = vsub.f32 %v2645_v41, %v743_v0 }
 0x284   : > { %v2863_v5 = vpop.eup %1974  ;;  %1988 = vpow2.f32 %v915_v55  ;;  %1048 = vadd.xlane.f32.xlu0 %v1047_v1  ;;  %793 = vmax.xlane.f32.xlu1 %v792_v44  ;;  %v777_v1 = vmax.f32 %v2697_v3, %v2699_v4 }
 0x285   : > { %v2865_v17 = vpop.eup %1976  ;;  %1990 = vpow2.f32 %v917_v47  ;;  %v905_v57 = vmul.f32 1.442695, %v833_v45  ;;  %v907_v49 = vmul.f32 1.442695, %v834_v26 }
 0x286   : > { %1992 = vpow2.f32 %v919_v56  ;;  %v746_v50 = vpop.xlane.xlu1 %745  ;;  %v1050_v40 = vadd.f32 %v2865_v17, %v2863_v5 }
 0x287   : > { %1994 = vpow2.f32 %v905_v57  ;;  %v835_v41 = vsub.f32 %v2647_v42, %v746_v50  ;;  %v836_v59 = vsub.f32 %v2649_v43, %v746_v50 }
 0x288   : > { %v2873_v60 = vpop.eup %1978  ;;  %1996 = vpow2.f32 %v907_v49  ;;  %784 = vmax.xlane.f32.xlu0 %v783_v20  ;;  %1051 = vadd.xlane.f32.xlu1 %v1050_v40 }
 0x289   : > { %v2875_v29 = vpop.eup %1980  ;;  %v909_v54 = vmul.f32 1.442695, %v835_v41  ;;  %v911_v28 = vmul.f32 1.442695, %v836_v59 }
 0x28a   : > { %v737_v51 = vpop.xlane.xlu1 %736  ;;  %v1041_v52 = vadd.f32 %v2875_v29, %v2873_v60 }
 0x28b   : > { %1998 = vpow2.f32 %v909_v54  ;;  %v829_v42 = vsub.f32 %v2635_v36, %v737_v51  ;;  %v830_v43 = vsub.f32 %v2637_v37, %v737_v51 }
 0x28c   : > { %v2883_v47 = vpop.eup %1982  ;;  %2000 = vpow2.f32 %v911_v28  ;;  %1042 = vadd.xlane.f32.xlu0 %v1041_v52  ;;  %787 = vmax.xlane.f32.xlu1 %v786_v27 }
 0x28d   : > { %v2885_v62 = vpop.eup %1984  ;;  %v897_v55 = vmul.f32 1.442695, %v829_v42  ;;  %v899_v56 = vmul.f32 1.442695, %v830_v43 }
 0x28e   : > { %v740_v0 = vpop.xlane.xlu1 %739  ;;  %v1044_v44 = vadd.f32 %v2885_v62, %v2883_v47 }
 0x28f   : > { %2002 = vpow2.f32 %v897_v55  ;;  %v831_v36 = vsub.f32 %v2639_v38, %v740_v0  ;;  %v832_v37 = vsub.f32 %v2641_v39, %v740_v0  ;;  %v780_v38 = vmax.f32 %v2703_v6, %v2705_v7 }
 0x290   : > { %v2893_v45 = vpop.eup %1986  ;;  %2004 = vpow2.f32 %v899_v56  ;;  %778 = vmax.xlane.f32.xlu0 %v777_v1  ;;  %1045 = vadd.xlane.f32.xlu1 %v1044_v44 }
 0x291   : > { %v2895_v26 = vpop.eup %1988  ;;  %v901_v57 = vmul.f32 1.442695, %v831_v36  ;;  %v903_v49 = vmul.f32 1.442695, %v832_v37 }
 0x292   : > { %v2897_v50 = vpop.eup %1990  ;;  %v731_v20 = vpop.xlane.xlu1 %730  ;;  %v1035_v40 = vadd.f32 %v2895_v26, %v2893_v45 }
 0x293   : > { %v2903_v41 = vpop.eup %1992  ;;  %2006 = vpow2.f32 %v901_v57  ;;  %v825_v39 = vsub.f32 %v2627_v32, %v731_v20  ;;  %v826_v59 = vsub.f32 %v2629_v33, %v731_v20  ;;  %v3334_v57 = vld [vmem:[#allocation32_spill] sm:$0xff]  ;;  %v3335_v20 = vld [vmem:[#allocation33_spill] sm:$0xff] }
 0x294   : > { %v2907_v54 = vpop.eup %1994  ;;  %2008 = vpow2.f32 %v903_v49  ;;  %1036 = vadd.xlane.f32.xlu0 %v1035_v40  ;;  %781 = vmax.xlane.f32.xlu1 %v780_v38  ;;  %v1038_v43 = vadd.f32 %v2903_v41, %v2897_v50 }
 0x295   : > { %v2909_v28 = vpop.eup %1996  ;;  %v889_v51 = vmul.f32 1.442695, %v825_v39  ;;  %v891_v52 = vmul.f32 1.442695, %v826_v59  ;;  %v809_v39 = vpop.xlane.xlu0 %808 }
 0x296   : > { %v734_v27 = vpop.xlane.xlu1 %733  ;;  %v1029_v42 = vadd.f32 %v2909_v28, %v2907_v54 }
 0x297   : > { %2010 = vpow2.f32 %v889_v51  ;;  %v827_v32 = vsub.f32 %v2631_v34, %v734_v27  ;;  %v828_v33 = vsub.f32 %v2633_v35, %v734_v27 }
 0x298   : > { %v2917_v55 = vpop.eup %1998  ;;  %2012 = vpow2.f32 %v891_v52  ;;  %1030 = vadd.xlane.f32.xlu0 %v1029_v42  ;;  %1039 = vadd.xlane.f32.xlu1 %v1038_v43  ;;  %v3338_v43 = vld [vmem:[#allocation34_spill] sm:$0xff] }
 0x299   : > { %3331 = vst [vmem:[#allocation36_spill] sm:$0xff] %v2917_v55  ;;  %v2919_v56 = vpop.eup %2000  ;;  %v893_v0 = vmul.f32 1.442695, %v827_v32  ;;  %v895_v1 = vmul.f32 1.442695, %v828_v33  ;;  %v3339_v33 = vld [vmem:[#allocation35_spill] sm:$0xff] }
 0x29a   : > { %v1032_v44 = vadd.f32 %v2919_v56, %v2917_v55 }
 0x29b   : > { %2014 = vpow2.f32 %v893_v0 }
 0x29c   : > { %v2923_v36 = vpop.eup %2002  ;;  %2016 = vpow2.f32 %v895_v1  ;;  %1033 = vadd.xlane.f32.xlu1 %v1032_v44 }
 0x29d   : > { %3332 = vst [vmem:[#allocation37_spill] sm:$0xff] %v2923_v36  ;;  %v2925_v34 = vpop.eup %2004 }
 0x29e   : > { %3333 = vst [vmem:[#allocation38_spill] sm:$0xff] %v2925_v34  ;;  %v821_v35 = vpop.xlane.xlu1 %820  ;;  %v1023_v37 = vadd.f32 %v2925_v34, %v2923_v36  ;;  %v803_v36 = vpop.xlane.xlu0 %802 }
 0x29f   : > { %v885_v49 = vsub.f32 %v3334_v57, %v821_v35  ;;  %v886_v40 = vsub.f32 %v3335_v20, %v821_v35  ;;  %v3341_v35 = vld [vmem:[#allocation26_spill] sm:$0xff]  ;;  %v3342_v20 = vld [vmem:[#allocation27_spill] sm:$0xff] }
 0x2a0   : > { %v2931_v38 = vpop.eup %2006  ;;  %1024 = vadd.xlane.f32.xlu0 %v1023_v37  ;;  %v877_v37 = vsub.f32 %v3341_v35, %v809_v39 }
 0x2a1   : > { %3336 = vst [vmem:[#allocation32_spill] sm:$0xff] %v2931_v38  ;;  %v2933_v59 = vpop.eup %2008  ;;  %v1009_v51 = vmul.f32 1.442695, %v885_v49  ;;  %v1011_v52 = vmul.f32 1.442695, %v886_v40  ;;  %v878_v40 = vsub.f32 %v3342_v20, %v809_v39 }
 0x2a2   : > { %3337 = vst [vmem:[#allocation33_spill] sm:$0xff] %v2933_v59  ;;  %v824_v27 = vpop.xlane.xlu1 %823  ;;  %v1026_v42 = vadd.f32 %v2933_v59, %v2931_v38  ;;  %v3346_v59 = vld [vmem:[#allocation24_spill] sm:$0xff] }
 0x2a3   : > { %2018 = vpow2.f32 %v1009_v51  ;;  %v887_v32 = vsub.f32 %v3338_v43, %v824_v27  ;;  %v888_v0 = vsub.f32 %v3339_v33, %v824_v27  ;;  %v3343_v43 = vld [vmem:[#allocation30_spill] sm:$0xff]  ;;  %v995_v38 = vmul.f32 1.442695, %v878_v40 }
 0x2a4   : > { %v2939_v1 = vpop.eup %2010  ;;  %2020 = vpow2.f32 %v1011_v52  ;;  %1027 = vadd.xlane.f32.xlu1 %v1026_v42  ;;  %v874_v55 = vsub.f32 %v3346_v59, %v803_v36 }
 0x2a5   : > { %3340 = vst [vmem:[#allocation34_spill] sm:$0xff] %v2939_v1  ;;  %v2941_v44 = vpop.eup %2012  ;;  %v1013_v57 = vmul.f32 1.442695, %v887_v32  ;;  %v1015_v49 = vmul.f32 1.442695, %v888_v0  ;;  %v3345_v0 = vld [vmem:[#allocation23_spill] sm:$0xff] }
 0x2a6   : > { %v815_v34 = vpop.xlane.xlu1 %814  ;;  %v1017_v51 = vadd.f32 %v2941_v44, %v2939_v1  ;;  %v993_v32 = vmul.f32 1.442695, %v877_v37  ;;  %v873_v35 = vsub.f32 %v3345_v0, %v803_v36  ;;  %v3348_v36 = vld [vmem:[#allocation28_spill] sm:$0xff] }
 0x2a7   : > { %2022 = vpow2.f32 %v1013_v57  ;;  %v881_v27 = vsub.f32 %v2773_v23, %v815_v34  ;;  %v882_v33 = vsub.f32 %v3343_v43, %v815_v34  ;;  %v3347_v57 = vld [vmem:[#allocation31_spill] sm:$0xff] }
 0x2a8   : > { %v2949_v52 = vpop.eup %2014  ;;  %2024 = vpow2.f32 %v1015_v49  ;;  %1018 = vadd.xlane.f32.xlu0 %v1017_v51  ;;  %v985_v37 = vmul.f32 1.442695, %v873_v35  ;;  %v3350_v35 = vld [vmem:[#allocation25_spill] sm:$0xff] }
 0x2a9   : > { %3344 = vst [vmem:[#allocation35_spill] sm:$0xff] %v2949_v52  ;;  %v2951_v42 = vpop.eup %2016  ;;  %v1001_v39 = vmul.f32 1.442695, %v881_v27  ;;  %v1003_v20 = vmul.f32 1.442695, %v882_v33  ;;  %v3349_v33 = vld [vmem:[#allocation29_spill] sm:$0xff] }
 0x2aa   : > { %v818_v1 = vpop.xlane.xlu1 %817  ;;  %v1020_v23 = vadd.f32 %v2951_v42, %v2949_v52  ;;  %v987_v27 = vmul.f32 1.442695, %v874_v55 }
 0x2ab   : > { %2026 = vpow2.f32 %v1001_v39  ;;  %v883_v34 = vsub.f32 %v2779_v48, %v818_v1  ;;  %v884_v49 = vsub.f32 %v3347_v57, %v818_v1 }
 0x2ac   : > { %2028 = vpow2.f32 %v1003_v20  ;;  %1021 = vadd.xlane.f32.xlu1 %v1020_v23 }
 0x2ad   : > { %2030 = vpow2.f32 %v993_v32  ;;  %v1005_v51 = vmul.f32 1.442695, %v883_v34  ;;  %v1007_v43 = vmul.f32 1.442695, %v884_v49 }
 0x2ae   : > { %2032 = vpow2.f32 %v995_v38  ;;  %v812_v40 = vpop.xlane.xlu1 %811 }
 0x2af   : > { %2034 = vpow2.f32 %v1005_v51  ;;  %v879_v59 = vsub.f32 %v3348_v36, %v812_v40  ;;  %v880_v0 = vsub.f32 %v3349_v33, %v812_v40 }
 0x2b0   : > { %v2961_v52 = vpop.eup %2018  ;;  %2036 = vpow2.f32 %v1007_v43 }
 0x2b1   : > { %v2963_v48 = vpop.eup %2020  ;;  %2038 = vpow2.f32 %v985_v37  ;;  %v997_v1 = vmul.f32 1.442695, %v879_v59  ;;  %v999_v39 = vmul.f32 1.442695, %v880_v0 }
 0x2b2   : > { %2040 = vpow2.f32 %v987_v27  ;;  %v806_v32 = vpop.xlane.xlu1 %805  ;;  %v1107_v38 = vadd.f32 %v2963_v48, %v2961_v52 }
 0x2b3   : > { %2042 = vpow2.f32 %v997_v1  ;;  %v875_v55 = vsub.f32 %v2751_v30, %v806_v32  ;;  %v876_v20 = vsub.f32 %v3350_v35, %v806_v32 }
 0x2b4   : > { %v2969_v23 = vpop.eup %2022  ;;  %2044 = vpow2.f32 %v999_v39  ;;  %1108 = vadd.xlane.f32.xlu0 %v1107_v38 }
 0x2b5   : > { %v2971_v34 = vpop.eup %2024  ;;  %v989_v57 = vmul.f32 1.442695, %v875_v55  ;;  %v991_v49 = vmul.f32 1.442695, %v876_v20 }
 0x2b6   : > { %v1110_v37 = vadd.f32 %v2971_v34, %v2969_v23 }
 0x2b7   : > { %2046 = vpow2.f32 %v989_v57 }
 0x2b8   : > { %v2975_v51 = vpop.eup %2026  ;;  %2048 = vpow2.f32 %v991_v49  ;;  %1111 = vadd.xlane.f32.xlu1 %v1110_v37 }
 0x2b9   : > { %v2977_v43 = vpop.eup %2028 }
 0x2ba   : > { %v2979_v30 = vpop.eup %2030  ;;  %v1101_v27 = vadd.f32 %v2977_v43, %v2975_v51 }
 0x2bb   : > { %v2983_v40 = vpop.eup %2032 }
 0x2bc   : > { %v2985_v36 = vpop.eup %2034  ;;  %1102 = vadd.xlane.f32.xlu0 %v1101_v27  ;;  %v1095_v1 = vadd.f32 %v2983_v40, %v2979_v30 }
 0x2bd   : > { %v2987_v59 = vpop.eup %2036 }
 0x2be   : > { %v2989_v33 = vpop.eup %2038  ;;  %v1104_v0 = vadd.f32 %v2987_v59, %v2985_v36 }
 0x2bf   : > { %3351 = vst [vmem:[#allocation26_spill] sm:$0xff] %v2989_v33  ;;  %v2995_v39 = vpop.eup %2040 }
 0x2c0   : > { %3352 = vst [vmem:[#allocation27_spill] sm:$0xff] %v2995_v39  ;;  %v2997_v32 = vpop.eup %2042  ;;  %1105 = vadd.xlane.f32.xlu1 %v1104_v0  ;;  %1096 = vadd.xlane.f32.xlu0 %v1095_v1  ;;  %v1089_v35 = vadd.f32 %v2995_v39, %v2989_v33 }
 0x2c1   : > { %3353 = vst [vmem:[#allocation30_spill] sm:$0xff] %v2997_v32  ;;  %v2999_v38 = vpop.eup %2044 }
 0x2c2   : > { %3354 = vst [vmem:[#allocation23_spill] sm:$0xff] %v2999_v38  ;;  %v1098_v55 = vadd.f32 %v2999_v38, %v2997_v32 }
 0x2c4   : > { %v3005_v20 = vpop.eup %2046  ;;  %1099 = vadd.xlane.f32.xlu1 %v1098_v55  ;;  %1090 = vadd.xlane.f32.xlu0 %v1089_v35 }
 0x2c5   : > { %3355 = vst [vmem:[#allocation24_spill] sm:$0xff] %v3005_v20  ;;  %v3007_v57 = vpop.eup %2048 }
 0x2c6   : > { %3356 = vst [vmem:[#allocation31_spill] sm:$0xff] %v3007_v57  ;;  %v1092_v49 = vadd.f32 %v3007_v57, %v3005_v20 }
 0x2c8   : > { %1093 = vadd.xlane.f32.xlu1 %v1092_v49 }
 0x2fd   : > { %v1061_v37 = vpop.xlane.xlu0 %1060 }
 0x2fe   : > { %2050 = vrcp.f32 %v1061_v37 }
 0x301   : > { %v1064_v27 = vpop.xlane.xlu1 %1063  ;;  %v797_v0 = vpop.xlane.xlu0 %796 }
 0x302   : > { %2052 = vrcp.f32 %v1064_v27  ;;  %v869_v1 = vsub.f32 %v2733_v21, %v797_v0  ;;  %v870_v32 = vsub.f32 %v2735_v22, %v797_v0 }
 0x304   : > { %v977_v33 = vmul.f32 1.442695, %v869_v1  ;;  %v979_v39 = vmul.f32 1.442695, %v870_v32 }
 0x305   : > { %v800_v38 = vpop.xlane.xlu1 %799  ;;  %v1055_v55 = vpop.xlane.xlu0 %1054 }
 0x306   : > { %2054 = vpow2.f32 %v977_v33  ;;  %v871_v35 = vsub.f32 %v2739_v24, %v800_v38  ;;  %v872_v20 = vsub.f32 %v2741_v25, %v800_v38 }
 0x307   : > { %2056 = vpow2.f32 %v979_v39 }
 0x308   : > { %v981_v49 = vmul.f32 1.442695, %v871_v35  ;;  %v983_v37 = vmul.f32 1.442695, %v872_v20  ;;  %2058 = vrcp.f32 %v1055_v55 }
 0x309   : > { %v1058_v57 = vpop.xlane.xlu1 %1057  ;;  %v791_v27 = vpop.xlane.xlu0 %790 }
 0x30a   : > { %2060 = vpow2.f32 %v981_v49  ;;  %v865_v21 = vsub.f32 %v2721_v15, %v791_v27  ;;  %v866_v22 = vsub.f32 %v2723_v16, %v791_v27 }
 0x30b   : > { %v2051_v32 = vpop.eup %2050  ;;  %2062 = vpow2.f32 %v983_v37 }
 0x30c   : > { %2064 = vrcp.f32 %v1058_v57  ;;  %v969_v33 = vmul.f32 1.442695, %v865_v21  ;;  %v971_v0 = vmul.f32 1.442695, %v866_v22  ;;  %v1174_v24 = vmul.f32 %v2051_v32, %v2815_v58 }
 0x30d   : > { %v794_v25 = vpop.xlane.xlu1 %793  ;;  %v1049_v39 = vpop.xlane.xlu0 %1048  ;;  %v1173_v38 = vmul.f32 %v2051_v32, %v2813_v14 }
 0x30e   : > { %2066 = vpow2.f32 %v969_v33  ;;  %v867_v20 = vsub.f32 %v2727_v18, %v794_v25  ;;  %v868_v1 = vsub.f32 %v2729_v19, %v794_v25 }
 0x30f   : > { %v2053_v15 = vpop.eup %2052  ;;  %2068 = vpow2.f32 %v971_v0  ;;  %v1839_v16 = vpack.c.bf16 %v1174_v24, %v1173_v38 }
 0x310   : > { %v973_v55 = vmul.f32 1.442695, %v867_v20  ;;  %v975_v35 = vmul.f32 1.442695, %v868_v1  ;;  %2070 = vrcp.f32 %v1049_v39  ;;  %v1176_v57 = vmul.f32 %v2053_v15, %v2823_v53 }
 0x311   : > { %v1052_v49 = vpop.xlane.xlu1 %1051  ;;  %v785_v37 = vpop.xlane.xlu0 %784  ;;  %v1175_v58 = vmul.f32 %v2053_v15, %v2821_v63  ;;  %1415 = vst [vmem:[%s3024_s10 + $0x70] sm:$0xff] %v1839_v16 }
 0x312   : > { %2072 = vpow2.f32 %v973_v55  ;;  %v861_v18 = vsub.f32 %v2709_v9, %v785_v37  ;;  %v862_v19 = vsub.f32 %v2711_v10, %v785_v37  ;;  %v1224_v14 = vpack.c.bf16 %v1176_v57, %v1174_v24 }
 0x313   : > { %v3029_v27 = vpop.eup %2054  ;;  %2074 = vpow2.f32 %v975_v35  ;;  %v1223_v21 = vpack.c.bf16 %v1175_v58, %v1173_v38  ;;  %v1840_v53 = vpack.c.bf16 %v1176_v57, %v1175_v58 }
 0x314   : > { %v3031_v22 = vpop.eup %2056  ;;  %2076 = vrcp.f32 %v1052_v49  ;;  %v961_v63 = vmul.f32 1.442695, %v861_v18  ;;  %v963_v32 = vmul.f32 1.442695, %v862_v19  ;;  %1445 = vmatprep.subr.bf16.mxu1 %v1224_v14 }
 0x315   : > { %v2059_v33 = vpop.eup %2058  ;;  %v788_v0 = vpop.xlane.xlu1 %787  ;;  %1416 = vst [vmem:[%s3024_s10 + $0x78] sm:$0xff] %v1840_v53  ;;  %1446 = vmatpush1.bf16.xpose.msra.mxu1 %v1223_v21  ;;  %v1083_v9 = vadd.f32 %v3031_v22, %v3029_v27 }
 0x316   : > { %v1043_v25 = vpop.xlane.xlu0 %1042  ;;  %2078 = vpow2.f32 %v961_v63  ;;  %v863_v10 = vsub.f32 %v2715_v12, %v788_v0  ;;  %v864_v24 = vsub.f32 %v2717_v13, %v788_v0  ;;  %v1170_v39 = vmul.f32 %v2059_v33, %v2833_v2 }
 0x317   : > { %v3039_v38 = vpop.eup %2060  ;;  %2080 = vpow2.f32 %v963_v32  ;;  %1084 = vadd.xlane.f32.xlu0 %v1083_v9  ;;  %v1169_v20 = vmul.f32 %v2059_v33, %v2831_v8 }
 0x318   : > { %v3042_v1 = vpop.eup %2062  ;;  %v965_v15 = vmul.f32 1.442695, %v863_v10  ;;  %v967_v16 = vmul.f32 1.442695, %v864_v24  ;;  %2082 = vrcp.f32 %v1043_v25 }
 0x319   : > { %v2065_v55 = vpop.eup %2064  ;;  %v1046_v35 = vpop.xlane.xlu1 %1045  ;;  %v1086_v12 = vadd.f32 %v3042_v1, %v3039_v38  ;;  %v1837_v13 = vpack.c.bf16 %v1170_v39, %v1169_v20 }
 0x31a   : > { %v779_v57 = vpop.xlane.xlu0 %778  ;;  %2084 = vpow2.f32 %v965_v15  ;;  %v1172_v8 = vmul.f32 %v2065_v55, %v2843_v11  ;;  %v1171_v58 = vmul.f32 %v2065_v55, %v2841_v31 }
 0x31b   : > { %v857_v2 = vsub.f32 %v2697_v3, %v779_v57  ;;  %v858_v49 = vsub.f32 %v2699_v4, %v779_v57  ;;  %v3049_v37 = vpop.eup %2066  ;;  %2086 = vpow2.f32 %v967_v16  ;;  %1087 = vadd.xlane.f32.xlu1 %v1086_v12  ;;  %1413 = vst [vmem:[%s3024_s10 + $0x60] sm:$0xff] %v1837_v13 }
 0x31c   : > { %v3053_v18 = vpop.eup %2068  ;;  %2088 = vrcp.f32 %v1046_v35  ;;  %v1222_v21 = vpack.c.bf16 %v1172_v8, %v1170_v39  ;;  %v1221_v63 = vpack.c.bf16 %v1171_v58, %v1169_v20  ;;  %v1838_v4 = vpack.c.bf16 %v1172_v8, %v1171_v58 }
 0x31d   : > { %v953_v19 = vmul.f32 1.442695, %v857_v2  ;;  %v955_v14 = vmul.f32 1.442695, %v858_v49  ;;  %v2071_v53 = vpop.eup %2070  ;;  %v782_v3 = vpop.xlane.xlu1 %781  ;;  %v1077_v11 = vadd.f32 %v3053_v18, %v3049_v37 }
 0x31e   : > { %v1037_v32 = vpop.xlane.xlu0 %1036  ;;  %1447 = vmatprep.subr.bf16.mxu1 %v1222_v21  ;;  %v859_v31 = vsub.f32 %v2703_v6, %v782_v3  ;;  %v860_v33 = vsub.f32 %v2705_v7, %v782_v3  ;;  %v1166_v0 = vmul.f32 %v2071_v53, %v2855_v46  ;;  %1414 = vst [vmem:[%s3024_s10 + $0x68] sm:$0xff] %v1838_v4 }
 0x31f   : > { %2090 = vpow2.f32 %v953_v19  ;;  %v3060_v25 = vpop.eup %2072  ;;  %1448 = vmatpush1.bf16.xpose.msra.mxu1 %v1221_v63  ;;  %1078 = vadd.xlane.f32.xlu0 %v1077_v11  ;;  %v1165_v9 = vmul.f32 %v2071_v53, %v2853_v61 }
 0x320   : > { %2092 = vpow2.f32 %v955_v14  ;;  %v3064_v10 = vpop.eup %2074  ;;  %v957_v24 = vmul.f32 1.442695, %v859_v31  ;;  %v959_v39 = vmul.f32 1.442695, %v860_v33 }
 0x321   : > { %2094 = vrcp.f32 %v1037_v32  ;;  %v2077_v20 = vpop.eup %2076  ;;  %v1040_v6 = vpop.xlane.xlu1 %1039  ;;  %v1080_v7 = vadd.f32 %v3064_v10, %v3060_v25  ;;  %v1835_v46 = vpack.c.bf16 %v1166_v0, %v1165_v9 }
 0x322   : > { %2096 = vpow2.f32 %v957_v24  ;;  %v1031_v15 = vpop.xlane.xlu0 %1030  ;;  %v1168_v16 = vmul.f32 %v2077_v20, %v2865_v17  ;;  %v1167_v55 = vmul.f32 %v2077_v20, %v2863_v5 }
 0x323   : > { %v3070_v61 = vpop.eup %2078  ;;  %2098 = vpow2.f32 %v959_v39  ;;  %1081 = vadd.xlane.f32.xlu1 %v1080_v7  ;;  %1411 = vst [vmem:[%s3024_s10 + $0x50] sm:$0xff] %v1835_v46 }
 0x324   : > { %v3073_v35 = vpop.eup %2080  ;;  %2100 = vrcp.f32 %v1040_v6  ;;  %v1220_v57 = vpack.c.bf16 %v1168_v16, %v1166_v0  ;;  %v1219_v12 = vpack.c.bf16 %v1167_v55, %v1165_v9  ;;  %v1836_v13 = vpack.c.bf16 %v1168_v16, %v1167_v55 }
 0x325   : > { %v2083_v2 = vpop.eup %2082  ;;  %2102 = vrcp.f32 %v1031_v15  ;;  %v1034_v49 = vpop.xlane.xlu1 %1033  ;;  %v1071_v17 = vadd.f32 %v3073_v35, %v3070_v61 }
 0x326   : > { %1449 = vmatprep.subr.bf16.mxu1 %v1220_v57  ;;  %2104 = vrcp.f32 %v1034_v49  ;;  %1412 = vst [vmem:[%s3024_s10 + $0x58] sm:$0xff] %v1836_v13  ;;  %v1162_v5 = vmul.f32 %v2083_v2, %v2875_v29  ;;  %v1161_v8 = vmul.f32 %v2083_v2, %v2873_v60 }
 0x327   : > { %v3080_v58 = vpop.eup %2084  ;;  %1450 = vmatpush1.bf16.xpose.msra.mxu1 %v1219_v12  ;;  %1072 = vadd.xlane.f32.xlu0 %v1071_v17 }
 0x328   : > { %v3082_v19 = vpop.eup %2086  ;;  %v1833_v14 = vpack.c.bf16 %v1162_v5, %v1161_v8 }
 0x329   : > { %v2089_v21 = vpop.eup %2088  ;;  %v1025_v53 = vpop.xlane.xlu0 %1024  ;;  %v1074_v3 = vadd.f32 %v3082_v19, %v3080_v58 }
 0x32a   : > { %2106 = vrcp.f32 %v1025_v53  ;;  %v1164_v63 = vmul.f32 %v2089_v21, %v2885_v62  ;;  %v1163_v29 = vmul.f32 %v2089_v21, %v2883_v47  ;;  %1409 = vst [vmem:[%s3024_s10 + $0x40] sm:$0xff] %v1833_v14  ;;  %v3359_v53 = vld [vmem:[#allocation37_spill] sm:$0xff] }
 0x32b   : > { %1075 = vadd.xlane.f32.xlu1 %v1074_v3 }
 0x32c   : > { %v3089_v60 = vpop.eup %2090  ;;  %v1218_v32 = vpack.c.bf16 %v1164_v63, %v1162_v5  ;;  %v1217_v11 = vpack.c.bf16 %v1163_v29, %v1161_v8  ;;  %v1834_v31 = vpack.c.bf16 %v1164_v63, %v1163_v29  ;;  %v3357_v5 = vld [vmem:[#allocation36_spill] sm:$0xff]  ;;  %v3360_v29 = vld [vmem:[#allocation33_spill] sm:$0xff] }
 0x32d   : > { %v3091_v4 = vpop.eup %2092  ;;  %v1028_v0 = vpop.xlane.xlu1 %1027 }
 0x32e   : > { %v2095_v33 = vpop.eup %2094  ;;  %v1065_v9 = vadd.f32 %v3091_v4, %v3089_v60  ;;  %1451 = vmatprep.subr.bf16.mxu1 %v1218_v32  ;;  %2108 = vrcp.f32 %v1028_v0  ;;  %1410 = vst [vmem:[%s3024_s10 + $0x48] sm:$0xff] %v1834_v31 }
 0x32f   : > { %v1158_v47 = vmul.f32 %v2095_v33, %v2895_v26  ;;  %v1157_v62 = vmul.f32 %v2095_v33, %v2893_v45  ;;  %v3098_v24 = vpop.eup %2096  ;;  %1452 = vmatpush1.bf16.xpose.msra.mxu1 %v1217_v11  ;;  %v3361_v11 = vld [vmem:[#allocation32_spill] sm:$0xff] }
 0x330   : > { %1066 = vadd.xlane.f32.xlu0 %v1065_v9  ;;  %v3100_v39 = vpop.eup %2098 }
 0x331   : > { %v1831_v20 = vpack.c.bf16 %v1158_v47, %v1157_v62  ;;  %v2101_v6 = vpop.eup %2100  ;;  %v1019_v7 = vpop.xlane.xlu0 %1018  ;;  %v1068_v46 = vadd.f32 %v3100_v39, %v3098_v24 }
 0x332   : > { %v2103_v15 = vpop.eup %2102  ;;  %2110 = vrcp.f32 %v1019_v7  ;;  %v1160_v16 = vmul.f32 %v2101_v6, %v2903_v41  ;;  %v1159_v26 = vmul.f32 %v2101_v6, %v2897_v50  ;;  %v3362_v6 = vld [vmem:[#allocation34_spill] sm:$0xff] }
 0x333   : > { %1407 = vst [vmem:[%s3024_s10 + $0x30] sm:$0xff] %v1831_v20  ;;  %v2105_v45 = vpop.eup %2104  ;;  %1069 = vadd.xlane.f32.xlu1 %v1068_v46  ;;  %v1154_v55 = vmul.f32 %v2103_v15, %v2909_v28  ;;  %v1153_v57 = vmul.f32 %v2103_v15, %v2907_v54  ;;  %v3358_v54 = vld [vmem:[#allocation38_spill] sm:$0xff] }
 0x334   : > { %v1216_v12 = vpack.c.bf16 %v1160_v16, %v1158_v47  ;;  %v1215_v13 = vpack.c.bf16 %v1159_v26, %v1157_v62  ;;  %v1832_v2 = vpack.c.bf16 %v1160_v16, %v1159_v26  ;;  %v1156_v49 = vmul.f32 %v2105_v45, %v2919_v56 }
 0x335   : > { %v1022_v17 = vpop.xlane.xlu1 %1021  ;;  %v1155_v41 = vmul.f32 %v2105_v45, %v3357_v5  ;;  %v1829_v8 = vpack.c.bf16 %v1154_v55, %v1153_v57  ;;  %v3363_v45 = vld [vmem:[#allocation35_spill] sm:$0xff] }
 0x336   : > { %1453 = vmatprep.subr.bf16.mxu1 %v1216_v12  ;;  %2112 = vrcp.f32 %v1022_v17  ;;  %1408 = vst [vmem:[%s3024_s10 + $0x38] sm:$0xff] %v1832_v2  ;;  %v1214_v50 = vpack.c.bf16 %v1156_v49, %v1154_v55 }
 0x337   : > { %v2107_v14 = vpop.eup %2106  ;;  %1454 = vmatpush1.bf16.xpose.msra.mxu1 %v1215_v13  ;;  %v1830_v28 = vpack.c.bf16 %v1156_v49, %v1155_v41  ;;  %1405 = vst [vmem:[%s3024_s10 + $0x20] sm:$0xff] %v1829_v8  ;;  %v1213_v33 = vpack.c.bf16 %v1155_v41, %v1153_v57 }
 0x338   : > { %1455 = vmatprep.subr.bf16.mxu1 %v1214_v50  ;;  %v1150_v21 = vmul.f32 %v2107_v14, %v3358_v54  ;;  %v1149_v3 = vmul.f32 %v2107_v14, %v3359_v53  ;;  %v1953_v53 = vld [vmem:[%s2584_s16 + $0x4] ss:$8 sps:$4 sm:$0xff]  }
 0x339   : > { %1406 = vst [vmem:[%s3024_s10 + $0x28] sm:$0xff] %v1830_v28  ;;  %1477 = vmatprep.mubr.bf16.mxu1 %v1953_v53 }
 0x33a   : > { %v1827_v56 = vpack.c.bf16 %v1150_v21, %v1149_v3 }
 0x33b   : > { %v2109_v63 = vpop.eup %2108 }
 0x33c   : > { %v1152_v32 = vmul.f32 %v2109_v63, %v3360_v29  ;;  %v1151_v31 = vmul.f32 %v2109_v63, %v3361_v11  ;;  %1403 = vst [vmem:[%s3024_s10 + $0x10] sm:$0xff] %v1827_v56 }
 0x33d   : > { %v1109_v0 = vpop.xlane.xlu0 %1108 }
 0x33e   : > { %2114 = vrcp.f32 %v1109_v0  ;;  %v1212_v9 = vpack.c.bf16 %v1152_v32, %v1150_v21  ;;  %v1828_v47 = vpack.c.bf16 %v1152_v32, %v1151_v31  ;;  %v1211_v57 = vpack.c.bf16 %v1151_v31, %v1149_v3 }
 0x33f   : > { %v2111_v62 = vpop.eup %2110  ;;  %1456 = vmatpush1.bf16.xpose.msra.mxu1 %v1213_v33 }
 0x340   : > { %1457 = vmatprep.subr.bf16.mxu1 %v1212_v9  ;;  %1404 = vst [vmem:[%s3024_s10 + $0x18] sm:$0xff] %v1828_v47  ;;  %v1146_v20 = vmul.f32 %v2111_v62, %v2941_v44  ;;  %v1145_v7 = vmul.f32 %v2111_v62, %v3362_v6 }
 0x341   : > { %v1112_v46 = vpop.xlane.xlu1 %1111 }
 0x342   : > { %2116 = vrcp.f32 %v1112_v46  ;;  %v1825_v15 = vpack.c.bf16 %v1146_v20, %v1145_v7 }
 0x343   : > { %v2113_v16 = vpop.eup %2112 }
 0x344   : > { %v1148_v26 = vmul.f32 %v2113_v16, %v2951_v42  ;;  %v1147_v55 = vmul.f32 %v2113_v16, %v3363_v45  ;;  %1401 = vst [vmem:[%s3024_s10] sm:$0xff] %v1825_v15  ;;  %v3366_v15 = vld [vmem:[#allocation27_spill] sm:$0xff]  ;;  %v3367_v16 = vld [vmem:[#allocation26_spill] sm:$0xff] }
 0x345   : > { %v1103_v12 = vpop.xlane.xlu0 %1102 }
 0x346   : > { %2118 = vrcp.f32 %v1103_v12  ;;  %v1210_v13 = vpack.c.bf16 %v1148_v26, %v1146_v20  ;;  %v1826_v2 = vpack.c.bf16 %v1148_v26, %v1147_v55  ;;  %v1209_v8 = vpack.c.bf16 %v1147_v55, %v1145_v7  ;;  %v3364_v7 = vld [vmem:[#allocation23_spill] sm:$0xff] }
 0x347   : > { %1458 = vmatpush1.bf16.xpose.msra.mxu1 %v1211_v57  ;;  %v3368_v12 = vld [vmem:[#allocation31_spill] sm:$0xff] }
 0x348   : > { %1459 = vmatprep.subr.bf16.mxu1 %v1210_v13  ;;  %1402 = vst [vmem:[%s3024_s10 + $0x8] sm:$0xff] %v1826_v2  ;;  %v3369_v2 = vld [vmem:[#allocation24_spill] sm:$0xff] }
 0x349   : > { %v1106_v44 = vpop.xlane.xlu1 %1105  ;;  %v1097_v49 = vpop.xlane.xlu0 %1096 }
 0x34a   : > { %2120 = vrcp.f32 %v1106_v44 }
 0x34b   : > { %v2115_v17 = vpop.eup %2114  ;;  %2122 = vrcp.f32 %v1097_v49 }
 0x34c   : > { %v1206_v42 = vmul.f32 %v2115_v17, %v2963_v48  ;;  %v1205_v5 = vmul.f32 %v2115_v17, %v2961_v52 }
 0x34d   : > { %v1100_v41 = vpop.xlane.xlu1 %1099  ;;  %v1091_v50 = vpop.xlane.xlu0 %1090 }
 0x34e   : > { %2124 = vrcp.f32 %v1100_v41  ;;  %v1855_v14 = vpack.c.bf16 %v1206_v42, %v1205_v5 }
 0x34f   : > { %v2117_v28 = vpop.eup %2116  ;;  %1460 = vmatpush1.bf16.xpose.msra.mxu1 %v1209_v8  ;;  %2126 = vrcp.f32 %v1091_v50 }
 0x350   : > { %v1208_v54 = vmul.f32 %v2117_v28, %v2971_v34  ;;  %v1207_v21 = vmul.f32 %v2117_v28, %v2969_v23  ;;  %1431 = vst [vmem:[%s3024_s10 + $0xf0] sm:$0xff] %v1855_v14 }
 0x351   : > { %v1094_v3 = vpop.xlane.xlu1 %1093 }
 0x352   : > { %2128 = vrcp.f32 %v1094_v3  ;;  %v1240_v48 = vpack.c.bf16 %v1208_v54, %v1206_v42  ;;  %v1856_v52 = vpack.c.bf16 %v1208_v54, %v1207_v21  ;;  %v1239_v63 = vpack.c.bf16 %v1207_v21, %v1205_v5 }
 0x353   : > { %v2119_v56 = vpop.eup %2118 }
 0x354   : > { %1461 = vmatprep.subr.bf16.mxu1 %v1240_v48  ;;  %1432 = vst [vmem:[%s3024_s10 + $0xf8] sm:$0xff] %v1856_v52  ;;  %v1202_v29 = vmul.f32 %v2119_v56, %v2977_v43  ;;  %v1201_v32 = vmul.f32 %v2119_v56, %v2975_v51 }
 0x356   : > { %v1853_v11 = vpack.c.bf16 %v1202_v29, %v1201_v32 }
 0x357   : > { %v2121_v34 = vpop.eup %2120  ;;  %1462 = vmatpush2.bf16.xpose.msra.mxu1 %v1239_v63 }
 0x358   : > { %v2123_v23 = vpop.eup %2122  ;;  %v1204_v31 = vmul.f32 %v2121_v34, %v2987_v59  ;;  %v1203_v33 = vmul.f32 %v2121_v34, %v2985_v36  ;;  %1429 = vst [vmem:[%s3024_s10 + $0xe0] sm:$0xff] %v1853_v11  ;;  %v3365_v59 = vld [vmem:[#allocation30_spill] sm:$0xff] }
 0x359   : > { %v1198_v0 = vmul.f32 %v2123_v23, %v2983_v40  ;;  %v1197_v9 = vmul.f32 %v2123_v23, %v2979_v30 }
 0x35a   : > { %v1238_v47 = vpack.c.bf16 %v1204_v31, %v1202_v29  ;;  %v1854_v62 = vpack.c.bf16 %v1204_v31, %v1203_v33  ;;  %v1237_v20 = vpack.c.bf16 %v1203_v33, %v1201_v32 }
 0x35b   : > { %v2125_v43 = vpop.eup %2124  ;;  %v1851_v51 = vpack.c.bf16 %v1198_v0, %v1197_v9 }
 0x35c   : > { %v2127_v6 = vpop.eup %2126  ;;  %1463 = vmatprep.subr.bf16.mxu1 %v1238_v47  ;;  %1430 = vst [vmem:[%s3024_s10 + $0xe8] sm:$0xff] %v1854_v62  ;;  %v1200_v46 = vmul.f32 %v2125_v43, %v3364_v7  ;;  %v1199_v36 = vmul.f32 %v2125_v43, %v3365_v59 }
 0x35d   : > { %1427 = vst [vmem:[%s3024_s10 + $0xd0] sm:$0xff] %v1851_v51  ;;  %v1194_v40 = vmul.f32 %v2127_v6, %v3366_v15  ;;  %v1193_v30 = vmul.f32 %v2127_v6, %v3367_v16 }
 0x35e   : > { %v1236_v26 = vpack.c.bf16 %v1200_v46, %v1198_v0  ;;  %v1852_v45 = vpack.c.bf16 %v1200_v46, %v1199_v36  ;;  %v1235_v17 = vpack.c.bf16 %v1199_v36, %v1197_v9 }
 0x35f   : > { %v2129_v55 = vpop.eup %2128  ;;  %1464 = vmatpush2.bf16.xpose.msra.mxu1 %v1237_v20  ;;  %v1849_v57 = vpack.c.bf16 %v1194_v40, %v1193_v30 }
 0x360   : > { %1465 = vmatprep.subr.bf16.mxu1 %v1236_v26  ;;  %1428 = vst [vmem:[%s3024_s10 + $0xd8] sm:$0xff] %v1852_v45  ;;  %v1196_v13 = vmul.f32 %v2129_v55, %v3368_v12  ;;  %v1195_v44 = vmul.f32 %v2129_v55, %v3369_v2 }
 0x361   : > { %1425 = vst [vmem:[%s3024_s10 + $0xc0] sm:$0xff] %v1849_v57 }
 0x362   : > { %v1850_v49 = vpack.c.bf16 %v1196_v13, %v1195_v44  ;;  %v1234_v42 = vpack.c.bf16 %v1196_v13, %v1194_v40  ;;  %v1233_v5 = vpack.c.bf16 %v1195_v44, %v1193_v30 }
 0x364   : > { %1426 = vst [vmem:[%s3024_s10 + $0xc8] sm:$0xff] %v1850_v49 }
 0x367   : > { %1466 = vmatpush2.bf16.xpose.msra.mxu1 %v1235_v17 }
 0x368   : > { %1467 = vmatprep.subr.bf16.mxu1 %v1234_v42 }
 0x36f   : > { %1468 = vmatpush2.bf16.xpose.msra.mxu1 %v1233_v5 }
 0x3a0   : > { %v1085_v41 = vpop.xlane.xlu0 %1084 }
 0x3a1   : > { %2130 = vrcp.f32 %v1085_v41 }
 0x3a4   : > { %v1088_v8 = vpop.xlane.xlu1 %1087 }
 0x3a5   : > { %2132 = vrcp.f32 %v1088_v8 }
 0x3a8   : > { %v1079_v50 = vpop.xlane.xlu0 %1078 }
 0x3a9   : > { %2134 = vrcp.f32 %v1079_v50 }
 0x3ac   : > { %v1082_v14 = vpop.xlane.xlu1 %1081 }
 0x3ad   : > { %2136 = vrcp.f32 %v1082_v14 }
 0x3ae   : > { %v2131_v28 = vpop.eup %2130 }
 0x3af   : > { %v1190_v54 = vmul.f32 %v2131_v28, %v3031_v22  ;;  %v1189_v21 = vmul.f32 %v2131_v28, %v3029_v27 }
 0x3b0   : > { %v1073_v53 = vpop.xlane.xlu0 %1072 }
 0x3b1   : > { %2138 = vrcp.f32 %v1073_v53  ;;  %v1847_v3 = vpack.c.bf16 %v1190_v54, %v1189_v21 }
 0x3b2   : > { %v2133_v48 = vpop.eup %2132 }
 0x3b3   : > { %v1192_v52 = vmul.f32 %v2133_v48, %v3042_v1  ;;  %v1191_v56 = vmul.f32 %v2133_v48, %v3039_v38  ;;  %1423 = vst [vmem:[%s3024_s10 + $0xb0] sm:$0xff] %v1847_v3 }
 0x3b4   : > { %v1076_v63 = vpop.xlane.xlu1 %1075 }
 0x3b5   : > { %2140 = vrcp.f32 %v1076_v63  ;;  %v1232_v29 = vpack.c.bf16 %v1192_v52, %v1190_v54  ;;  %v1231_v32 = vpack.c.bf16 %v1191_v56, %v1189_v21  ;;  %v1848_v11 = vpack.c.bf16 %v1192_v52, %v1191_v56 }
 0x3b6   : > { %v2135_v34 = vpop.eup %2134 }
 0x3b7   : > { %1469 = vmatprep.subr.bf16.mxu1 %v1232_v29  ;;  %1424 = vst [vmem:[%s3024_s10 + $0xb8] sm:$0xff] %v1848_v11  ;;  %v1186_v27 = vmul.f32 %v2135_v34, %v3053_v18  ;;  %v1185_v22 = vmul.f32 %v2135_v34, %v3049_v37 }
 0x3b8   : > { %1470 = vmatpush2.bf16.xpose.msra.mxu1 %v1231_v32 }
 0x3b9   : > { %v1067_v23 = vpop.xlane.xlu0 %1066  ;;  %v1845_v1 = vpack.c.bf16 %v1186_v27, %v1185_v22 }
 0x3ba   : > { %2142 = vrcp.f32 %v1067_v23  ;;  %v2137_v38 = vpop.eup %2136 }
 0x3bb   : > { %v1188_v31 = vmul.f32 %v2137_v38, %v3064_v10  ;;  %v1187_v33 = vmul.f32 %v2137_v38, %v3060_v25  ;;  %1421 = vst [vmem:[%s3024_s10 + $0xa0] sm:$0xff] %v1845_v1 }
 0x3bc   : > { %v1070_v0 = vpop.xlane.xlu1 %1069 }
 0x3bd   : > { %2144 = vrcp.f32 %v1070_v0  ;;  %v1230_v9 = vpack.c.bf16 %v1188_v31, %v1186_v27  ;;  %v1229_v47 = vpack.c.bf16 %v1187_v33, %v1185_v22  ;;  %v1846_v62 = vpack.c.bf16 %v1188_v31, %v1187_v33 }
 0x3be   : > { %v2139_v18 = vpop.eup %2138 }
 0x3bf   : > { %1471 = vmatprep.subr.bf16.mxu1 %v1230_v9  ;;  %1422 = vst [vmem:[%s3024_s10 + $0xa8] sm:$0xff] %v1846_v62  ;;  %v1182_v37 = vmul.f32 %v2139_v18, %v3073_v35  ;;  %v1181_v43 = vmul.f32 %v2139_v18, %v3070_v61 }
 0x3c0   : > { %1472 = vmatpush2.bf16.xpose.msra.mxu1 %v1229_v47 }
 0x3c1   : > { %v1843_v20 = vpack.c.bf16 %v1182_v37, %v1181_v43 }
 0x3c2   : > { %v2141_v10 = vpop.eup %2140 }
 0x3c3   : > { %v1184_v25 = vmul.f32 %v2141_v10, %v3082_v19  ;;  %v1183_v51 = vmul.f32 %v2141_v10, %v3080_v58  ;;  %1419 = vst [vmem:[%s3024_s10 + $0x90] sm:$0xff] %v1843_v20 }
 0x3c5   : > { %v1228_v6 = vpack.c.bf16 %v1184_v25, %v1182_v37  ;;  %v1227_v7 = vpack.c.bf16 %v1183_v51, %v1181_v43  ;;  %v1844_v46 = vpack.c.bf16 %v1184_v25, %v1183_v51 }
 0x3c7   : > { %v2143_v59 = vpop.eup %2142  ;;  %1473 = vmatprep.subr.bf16.mxu1 %v1228_v6  ;;  %1420 = vst [vmem:[%s3024_s10 + $0x98] sm:$0xff] %v1844_v46 }
 0x3c8   : > { %v1178_v35 = vmul.f32 %v2143_v59, %v3091_v4  ;;  %v1177_v61 = vmul.f32 %v2143_v59, %v3089_v60  ;;  %1474 = vmatpush2.bf16.xpose.msra.mxu1 %v1227_v7  ;;  %v1951_v4 = vld [vmem:[%s2584_s16] ss:$8 sps:$4 sm:$0xff]  }
 0x3ca   : > { %v1841_v19 = vpack.c.bf16 %v1178_v35, %v1177_v61  ;;  %v2145_v36 = vpop.eup %2144 }
 0x3cb   : > { %v1180_v58 = vmul.f32 %v2145_v36, %v3100_v39  ;;  %v1179_v15 = vmul.f32 %v2145_v36, %v3098_v24 }
 0x3cc   : > { %1417 = vst [vmem:[%s3024_s10 + $0x80] sm:$0xff] %v1841_v19 }
 0x3cd   : > { %v1226_v40 = vpack.c.bf16 %v1180_v58, %v1178_v35  ;;  %v1225_v16 = vpack.c.bf16 %v1179_v15, %v1177_v61  ;;  %v1842_v30 = vpack.c.bf16 %v1180_v58, %v1179_v15 }
 0x3cf   : > { %1475 = vmatprep.subr.bf16.mxu1 %v1226_v40  ;;  %1418 = vst [vmem:[%s3024_s10 + $0x88] sm:$0xff] %v1842_v30 }
 0x3d0   : > { %1476 = vmatpush2.bf16.xpose.msra.mxu1 %v1225_v16 }
 0x3d7   : > { %1478 = vmatmul.mubr.bf16.vlgmr.msra.gmra.mxu1 %v1951_v4 }
 0x3d8   : > { %2271 = shalt.err (!%p2268_p13)
}
 0x3d9   : > { %s2272_s17 = scalar_lea.hbm %s3181_s1, 4096  ;;  %s2276_s19 = scalar_lea.hbm %s3274_s6, 8192 }
 0x3da   : > { %p2273_p12 = scmp.ne.s32.totalorder %s3181_s1, %s2272_s17  ;;  %p2277_p1 = scmp.lt.s32.totalorder %s3181_s1, %s3274_s6 }
 0x3db   : > { %p2278_p2 = scmp.lt.s32.totalorder %s2276_s19, %s2272_s17 }
 0x3dc   : > { %p2274_p5 = pnand %p2273_p12, %p2487_p9 }
 0x3dd   : > { %p2279_p8 = por %p2278_p2, %p2277_p1 }
 0x3de   : > { %p2275_p6 = pneg %p2274_p5 }
 0x3e0   : > { %p2280_p0 = pnand %p2279_p8, %p2275_p6 }
 0x3e2   : > { %2283 = shalt.err (!%p2280_p0)
}
 0x3e3   : > { %s2389_s28 = smov 128   ;;  %s2390_s10 = smov 8   ;;  %v1488_v39 = vld [vmem:[%s2589_s8] sm:$0xff]  ;;  %v1489_v55 = vld [vmem:[%s2589_s8 + $0x8] sm:$0xff]  ;;  %v1490_v2 = vld [vmem:[%s2589_s8 + $0x10] sm:$0xff] }
 0x3e4   : > { %1868 = dma.vmem_to_hbm [thread:$0]  (%p2487_p9), %s3183_s25, 4096, %s3181_s1, %s1512_s7, %s2389_s28, %s2389_s28, %s2390_s10  }
 0x3e5   : > { %s1492_s21 = sld [smem:[#allocation3]]  ;;  %s385_s12 = scalar_lea.vmem [#allocation12], %s1757_s15  ;;  %v1491_v42 = vld [vmem:[%s2589_s8 + $0x18] sm:$0xff] }
 0x3e6   : > { %s1527_s29 = sshll.u32 %s385_s12, 4  ;;  %s1857_s25 = sshll.u32 %s2368_s26, 9  ;;  %s3215_s29 = int_to_ptr.vmem [resolvable:$true] %s1527_s29 }
 0x3e7   : > { %s3220_s7 = scalar_lea.hbm %s3273_s5, %s1857_s25  ;;  %s1507_s30 = scalar_lea.sflag [#allocation6], %s2569_s14 }
 0x3e8   : > { %s2284_s26 = scalar_lea.vmem %s3215_s29, 512  ;;  %s2391_s8 = smov [#allocation12]  }
 0x3e9   : > { %p2285_p3 = scmp.ne.s32.totalorder %s3215_s29, %s2284_s26  ;;  %s2288_s2 = sshll.u32 %s2391_s8, 4  ;;  %s2289_s2 = int_to_ptr.vmem [resolvable:$false] %s2288_s2 }
 0x3ea   : > { %s2290_s3 = scalar_lea.vmem %s2289_s2, 1024  ;;  %p2291_p10 = scmp.lt.s32.totalorder %s3215_s29, %s2289_s2 }
 0x3eb   : > { %v1493_v60 = vstv %s1492_s21  ;;  %p2286_p4 = pnand %p2285_p3, %p2487_p9  ;;  %p2292_p13 = scmp.lt.s32.totalorder %s2290_s3, %s2284_s26 }
 0x3ed   : > { %p2287_p7 = pneg %p2286_p4  ;;  %p2293_p12 = por %p2292_p13, %p2291_p10 }
 0x3ef   : > { %p2294_p5 = pnand %p2293_p12, %p2287_p7 }
 0x497   : > { %v1479_v24 = vpop.f32.mrf.mxu1 }
 0x498   : > { %v1494_v26 = vmul.f32 %v1493_v60, %v1479_v24 }
 0x499   : > { %v1481_v45 = vpop.f32.mrf.mxu1 }
 0x49a   : > { %v1498_v57 = vadd.f32 %v1494_v26, %v1488_v39  ;;  %v1495_v12 = vmul.f32 %v1493_v60, %v1481_v45 }
 0x49b   : > { %v1483_v13 = vpop.f32.mrf.mxu1 }
 0x49c   : > { %1502 = vst [vmem:[%s385_s12] sm:$0xff] %v1498_v57  ;;  %v1499_v44 = vadd.f32 %v1495_v12, %v1489_v55  ;;  %v1496_v49 = vmul.f32 %v1493_v60, %v1483_v13 }
 0x49d   : > { %v1485_v17 = vpop.f32.mrf.mxu1 }
 0x49e   : > { %1503 = vst [vmem:[%s385_s12 + $0x8] sm:$0xff] %v1499_v44  ;;  %v1500_v5 = vadd.f32 %v1496_v49, %v1490_v2  ;;  %v1497_v41 = vmul.f32 %v1493_v60, %v1485_v17 }
 0x4a0   : > { %1504 = vst [vmem:[%s385_s12 + $0x10] sm:$0xff] %v1500_v5  ;;  %v1501_v8 = vadd.f32 %v1497_v41, %v1491_v42 }
 0x4a2   : > { %1505 = vst [vmem:[%s385_s12 + $0x18] sm:$0xff] %v1501_v8 }
 0x4a3   : > { %2297 = shalt.err (!%p2294_p5)
}
 0x4a4   : > { %s2298_s22 = scalar_lea.hbm %s3220_s7, 512  ;;  %s2302_s18 = scalar_lea.hbm %s3273_s5, 1024 }
 0x4a5   : > { %p2299_p6 = scmp.ne.s32.totalorder %s3220_s7, %s2298_s22  ;;  %p2303_p8 = scmp.lt.s32.totalorder %s3220_s7, %s3273_s5 }
 0x4a6   : > { %p2304_p0 = scmp.lt.s32.totalorder %s2302_s18, %s2298_s22 }
 0x4a7   : > { %p2300_p1 = pnand %p2299_p6, %p2487_p9 }
 0x4a8   : > { %p2305_p3 = por %p2304_p0, %p2303_p8 }
 0x4a9   : > { %p2301_p2 = pneg %p2300_p1 }
 0x4ab   : > { %p2306_p4 = pnand %p2305_p3, %p2301_p2 }
 0x4ad   : > { %2309 = shalt.err (!%p2306_p4)
}
 0x4ae   : > { %s2392_s20 = smov 256   ;;  %s2393_s28 = smov 16  }
 0x4af   : > { %1867 = dma.vmem_to_hbm [thread:$0]  (%p2487_p9), %s3215_s29, 512, %s3220_s7, %s1507_s30, %s2392_s20, %s2392_s20, %s2393_s28  }
 0x4b0 PF: > { %s1561_s10 = sand.u32 1, %s2356_s23   ;;  %p3370_p7 = scmp.ge.s32.totalorder %s2376_s0, 2 }
 0x4b1   : > { %s1562_s21 = scalar_lea.sflag [#allocation6], %s1561_s10 }
 0x4b2   : > { %p1885_p10 = pnand %p3370_p7, %p2494_p11 }
 0x4b4   : > { %p1886_p13 = pneg %p1885_p10 }
 0x4b6   : > { %2347 = dma.done.wait (%p1886_p13), %s1562_s21, 512  }
 0x4b7   : > { %2349 = vsyncadd (%p1886_p13), %s1562_s21, 4294966784  ;;  %s1571_s12 = scalar_lea.sflag [#allocation14], %s1561_s10 }
 0x4b8   : > { %2351 = dma.done.wait (%p1886_p13), %s1571_s12, 4096  }
 0x4b9   : > { %2353 = vsyncadd (%p1886_p13), %s1571_s12, 4294963200  ;;  %s33_s0 = sadd.s32 1, %s2376_s0   ;;  %s3371_s11 = sld [smem:[#allocation20_spill]] }
 0x4ba   : > { %p30_p12 = scmp.ge.s32.totalorder %s33_s0, 4   ;;  %s3372_s25 = sld [smem:[#allocation22_spill]] }
 0x4bb   : > { %s3373_s14 = sld [smem:[#allocation21_spill]]  ;;  %s3374_s23 = smov %s2360_s24 }
 0x4bc   : > { %s3376_s26 = smov %s2372_s27 }
 0x4bd   :  { %32 = sbr.rel (!%p30_p12) target bundleno = 17 (0x11), region = 135 }
 0x4bf   : > { %s3375_s24 = smov %s3371_s11 }
 0x4c1   : > { %s3377_s27 = smov %s3373_s14 }
 0x4c2   :  { %1576 = vsyncpa [#allocation5], 1 }
 0x4c3   :  { %1578 = vsyncpa [#allocation5 + $0x1], 1 }
 0x4c4   :  { %1579 = vsyncpa [#allocation8], 1 }
 0x4c5   :  { %1581 = vsyncpa [#allocation8 + $0x1], 1 }
 0x4c6   :  { %1582 = vsyncpa [#allocation11], 1 }
 0x4c7   :  { %1584 = vsyncpa [#allocation11 + $0x1], 1 }
 0x4c8   :  { %1585 = vsyncpa [#allocation6], 1 }
 0x4c9   :  { %1587 = vsyncpa [#allocation6 + $0x1], 1 }
 0x4ca   :  { %1588 = vsyncpa [#allocation14], 1 }
 0x4cb   :  { %1590 = vsyncpa [#allocation14 + $0x1], 1 }

</bundles_post_ra>
